<compile_context>
chip_gen: v7x
topology: tpu7x:2x2x1
jax: 0.10.0
libtpu: 0.0.40
codegen_flags: <defaults>
</compile_context>

<pallas_src>
import jax
import jax.numpy as jnp
from jax.experimental import pallas as pl
from jax.experimental.pallas import tpu as pltpu

IN_FEATURES = 196608     # nn.Linear(196608, 10)
OUT_FEATURES = 10
NUM_SPLITS = 2           # leading "parallel" grid axis (v7x has 2 TensorCores)
TK = 24576               # K tile: 196608 / (2 * 24576) = 4 K-steps per split
K_STEPS = IN_FEATURES // (NUM_SPLITS * TK)
assert IN_FEATURES == NUM_SPLITS * K_STEPS * TK


def linear_kernel(x_ref, w_ref, o_ref):
    """One K-tile of a partial y = x @ W.T, accumulated in the resident output.

    x_ref: (B, TK)            f32 -- K-slice of the input
    w_ref: (OUT_FEATURES, TK) f32 -- K-slice of the PyTorch-layout weight
    o_ref: (B, OUT_FEATURES)  f32 -- partial accumulator for this K-split
    """
    @pl.when(pl.program_id(1) == 0)
    def _():
        o_ref[...] = jnp.zeros_like(o_ref)

    # Contract the K (last) axis of both operands: (B, TK) x (N, TK) -> (B, N).
    o_ref[...] += jax.lax.dot_general(
        x_ref[...],
        w_ref[...],
        dimension_numbers=(((1,), (1,)), ((), ())),
        preferred_element_type=jnp.float32,
    )


def pallas_linear_partials(x, weight):
    """x: (B, K) f32, weight: (OUT_FEATURES, K) f32 -> (NUM_SPLITS, B, OUT)."""
    B, K = x.shape
    assert K == IN_FEATURES
    assert weight.shape == (OUT_FEATURES, IN_FEATURES)

    return pl.pallas_call(
        linear_kernel,
        out_shape=jax.ShapeDtypeStruct((NUM_SPLITS, B, OUT_FEATURES), jnp.float32),
        grid_spec=pltpu.PrefetchScalarGridSpec(
            num_scalar_prefetch=0,
            grid=(NUM_SPLITS, K_STEPS),
            in_specs=[
                # x K-tile: block index along K is c * K_STEPS + k
                pl.BlockSpec((B, TK), lambda c, k: (0, c * K_STEPS + k)),
                # weight K-tile, native (10, K) layout (lane-dense along K);
                # second-to-last dim 10 equals the full array dim -> legal.
                pl.BlockSpec((OUT_FEATURES, TK), lambda c, k: (0, c * K_STEPS + k)),
            ],
            # One (B, 10) partial per K-split, resident across the K axis.
            out_specs=pl.BlockSpec((None, B, OUT_FEATURES), lambda c, k: (c, 0, 0)),
        ),
        compiler_params=pltpu.CompilerParams(
            dimension_semantics=("parallel", "arbitrary"),
        ),
    )(x, weight)


@jax.jit
def model_forward(x, weight, bias):
    """Equivalent of Model.forward: nn.Linear(196608, 10)(x).

    weight: (OUT_FEATURES, IN_FEATURES) -- PyTorch convention, used as-is.
    bias:   (OUT_FEATURES,)
    """
    partials = pallas_linear_partials(x, weight)
    # Tiny epilogue (40 B of bias, 2x(B,10) partials): cheaper in the wrapper
    # than as extra BlockSpec / pipeline plumbing inside the kernel.
    return partials.sum(axis=0) + bias[None, :]


if __name__ == "__main__":
    key = jax.random.PRNGKey(0)
    kx, kw, kb = jax.random.split(key, 3)

    batch = 2
    # Deterministic PyTorch-style parameters: uniform(-1/sqrt(in), 1/sqrt(in)).
    bound = 1.0 / jnp.sqrt(jnp.float32(IN_FEATURES))
    weight = jax.random.uniform(
        kw, (OUT_FEATURES, IN_FEATURES), jnp.float32, -bound, bound
    )
    bias = jax.random.uniform(kb, (OUT_FEATURES,), jnp.float32, -bound, bound)
    x = jax.random.normal(kx, (batch, IN_FEATURES), jnp.float32)

    y = model_forward(x, weight, bias)
    y = jax.block_until_ready(y)

    # Sanity check against plain-JAX reference.
    y_ref = x @ weight.T + bias
    assert y.shape == (batch, OUT_FEATURES)
    assert jnp.allclose(y, y_ref, atol=1e-3, rtol=1e-3), float(
        jnp.max(jnp.abs(y - y_ref))
    )

    print("KERNEL_OK")
</pallas_src>

<mosaic_0001>
module attributes {stable_mosaic.version = 11 : i64} {
  func.func @linear_kernel(%arg0: i32, %arg1: i32, %arg2: memref<2x24576xf32, #tpu.memory_space<vmem>>, %arg3: memref<10x24576xf32, #tpu.memory_space<vmem>>, %arg4: memref<1x2x10xf32, #tpu.memory_space<vmem>>) attributes {dimension_semantics = [#tpu.dimension_semantics<parallel>, #tpu.dimension_semantics<arbitrary>], iteration_bounds = array<i64: 2, 4>, scalar_prefetch = 0 : i64, scratch_operands = 0 : i64, tpu.core_type = #tpu.core_type<tc>, window_params = [{transform_indices = @transform_0, window_bounds = array<i64: 2, 24576>}, {transform_indices = @transform_1, window_bounds = array<i64: 10, 24576>}, {transform_indices = @transform_2, window_bounds = array<i64: 1, 2, 10>}]} {
    %c0_i32 = arith.constant 0 : i32
    %0 = arith.cmpi eq, %arg1, %c0_i32 : i32
    %1 = arith.extui %0 : i1 to i32
    %c0_i32_0 = arith.constant 0 : i32
    %2 = arith.cmpi ne, %1, %c0_i32_0 : i32
    scf.if %2 {
      %cst_10 = arith.constant 0.000000e+00 : f32
      %12 = vector.broadcast %cst_10 : f32 to vector<2x10xf32>
      %c0_11 = arith.constant 0 : index
      %c0_12 = arith.constant 0 : index
      %c0_13 = arith.constant 0 : index
      %13 = vector.load %arg4[%c0_11, %c0_12, %c0_13] : memref<1x2x10xf32, #tpu.memory_space<vmem>>, vector<1x2x10xf32>
      %14 = vector.shape_cast %13 : vector<1x2x10xf32> to vector<2x10xf32>
      %15 = vector.shape_cast %12 : vector<2x10xf32> to vector<1x2x10xf32>
      tpu.vector_store %arg4[%c0_11, %c0_12, %c0_13], %15 {strides = array<i32>} : memref<1x2x10xf32, #tpu.memory_space<vmem>>, vector<1x2x10xf32>,
    } else {
    }
    %c0 = arith.constant 0 : index
    %c0_1 = arith.constant 0 : index
    %c0_2 = arith.constant 0 : index
    %3 = vector.load %arg4[%c0, %c0_1, %c0_2] : memref<1x2x10xf32, #tpu.memory_space<vmem>>, vector<1x2x10xf32>
    %4 = vector.shape_cast %3 : vector<1x2x10xf32> to vector<2x10xf32>
    %c0_3 = arith.constant 0 : index
    %c0_4 = arith.constant 0 : index
    %5 = vector.load %arg2[%c0_3, %c0_4] : memref<2x24576xf32, #tpu.memory_space<vmem>>, vector<2x24576xf32>
    %c0_5 = arith.constant 0 : index
    %c0_6 = arith.constant 0 : index
    %6 = vector.load %arg3[%c0_5, %c0_6] : memref<10x24576xf32, #tpu.memory_space<vmem>>, vector<10x24576xf32>
    %cst = arith.constant dense<0.000000e+00> : vector<2x10xf32>
    %7 = tpu.matmul %5, %6, %cst {dimension_numbers = #tpu.dot_dimension_numbers<[1], [1], [0], [0], [0, 0, 1, 0], [], []>} : vector<2x24576xf32>, vector<10x24576xf32>, vector<2x10xf32> -> vector<2x10xf32>
    %8 = arith.addf %4, %7 : vector<2x10xf32>
    %c0_7 = arith.constant 0 : index
    %c0_8 = arith.constant 0 : index
    %c0_9 = arith.constant 0 : index
    %9 = vector.load %arg4[%c0_7, %c0_8, %c0_9] : memref<1x2x10xf32, #tpu.memory_space<vmem>>, vector<1x2x10xf32>
    %10 = vector.shape_cast %9 : vector<1x2x10xf32> to vector<2x10xf32>
    %11 = vector.shape_cast %8 : vector<2x10xf32> to vector<1x2x10xf32>
    tpu.vector_store %arg4[%c0_7, %c0_8, %c0_9], %11 {strides = array<i32>} : memref<1x2x10xf32, #tpu.memory_space<vmem>>, vector<1x2x10xf32>,
    return
  }
  func.func @transform_0(%arg0: i32, %arg1: i32) -> (i32, i32) {
    %c4_i32 = arith.constant 4 : i32
    %0 = arith.muli %arg0, %c4_i32 : i32
    %1 = arith.addi %0, %arg1 : i32
    %c0_i32 = arith.constant 0 : i32
    %c0_i32_0 = arith.constant 0 : i32
    return %c0_i32, %1 : i32, i32
  }
  func.func @transform_1(%arg0: i32, %arg1: i32) -> (i32, i32) {
    %c4_i32 = arith.constant 4 : i32
    %0 = arith.muli %arg0, %c4_i32 : i32
    %1 = arith.addi %0, %arg1 : i32
    %c0_i32 = arith.constant 0 : i32
    %c0_i32_0 = arith.constant 0 : i32
    return %c0_i32, %1 : i32, i32
  }
  func.func @transform_2(%arg0: i32, %arg1: i32) -> (i32, i32, i32) {
    %c0_i32 = arith.constant 0 : i32
    %c0_i32_0 = arith.constant 0 : i32
    %c0_i32_1 = arith.constant 0 : i32
    return %arg0, %c0_i32, %c0_i32_0 : i32, i32, i32
  }
}

</mosaic_0001>

<bundles_post_ra>
// kernel: model_forward.1
= control target key start
LH: loop header
LB: loop body
LE: loop exit
PB: predicated region body
PF: predicated region fallthrough
CT: control target
= control target key end

     0   :  { %7 = vsyncpa [#allocation3], 0  ;;  %s9970_s0 = inlined_call_operand.hbm [shape: f32[2,196608], index: 0, kind: input, shape index: {}]   ;;  %s9971_s1 = inlined_call_operand.hbm [shape: f32[10,196608], index: 1, kind: input, shape index: {}]   ;;  %s9972_s2 = inlined_call_operand.vmem [shape: f32[2,2,10], index: 2, kind: output, shape index: {}]  }
   0x1   :  { %9 = vsyncpa [#allocation3 + $0x1], 0 }
   0x2   :  { %10 = vsyncpa [#allocation5], 0 }
   0x3   :  { %12 = vsyncpa [#allocation5 + $0x1], 0  ;;  %s9241_s9 = smov 0   ;;  %s9243_s10 = smov 0  }
   0x4   :  { %s9245_s11 = smov 0   ;;  %s9247_s12 = smov 0  }
   0x5   :  { %s9249_s13 = smov 0   ;;  %s9251_s14 = smov 0  }
   0x6   :  { %s9253_s15 = smov 0   ;;  %s9255_s16 = smov 0  }
   0x7 LB: > { %s8551_s17 = sadd.s32 4294967295, %s9217_s16   ;;  %s27_s18 = sadd.s32 1, %s9209_s14  ;;  %s9217_s16 = sphi %s9255_s16, %s18_s16   ;;  %s9213_s15 = sphi %s9253_s15, %s9984_s15   ;;  %s9209_s14 = sphi %s9251_s14, %s9983_s14   ;;  %s9205_s13 = sphi %s9249_s13, %s9982_s13   ;;  %s9201_s12 = sphi %s9247_s12, %s9981_s12   ;;  %s9197_s11 = sphi %s9245_s11, %s9980_s11   ;;  %s9193_s10 = sphi %s9243_s10, %s9979_s10   ;;  %s9189_s9 = sphi %s9241_s9, %s9978_s9  }
   0x8   : > { %p28_p0 = scmp.ge.s32.totalorder %s27_s18, 4  ;;  %s30_s19 = sadd.s32 1, %s9213_s15 }
   0x9   : > { %s8553_s20 = sshll.u32 %s9213_s15, 2  ;;  %s41_s21 = sadd.s32 1, %s9197_s11 }
   0xa   : > { %s9986_s18 = smov (%p28_p0, %s27_s18), 0  ;;  %s9988_s19 = smov (!%p28_p0, %s30_s19), %s9213_s15 }
   0xb   : > { %s9288_s22 = sadd.s32 %s9209_s14, %s8553_s20  ;;  %p48_p1 = scmp.ne.s32.totalorder %s9197_s11, %s9193_s10 }
   0xc   : > { %p32_p2 = scmp.ge.s32.totalorder %s9988_s19, 2  ;;  %p49_p3 = scmp.eq.s32.totalorder %s9217_s16, 0 }
   0xd   : > { %p54_p4 = scmp.ne.s32.totalorder %s9193_s10, %s9189_s9  ;;  %p55_p5 = scmp.eq.s32.totalorder %s8551_s17, 0 }
   0xe   : > { %s9990_s19 = smov (%p32_p2, %s9988_s19), 0  ;;  %p50_p6 = por %p49_p3, %p48_p1 }
   0xf   : > { %p9296_p7 = por %p55_p5, %p54_p4  ;;  %s8554_s24 = sshll.u32 %s9990_s19, 2 }
  0x10   : > { %s37_s25 = sadd.s32 %s8554_s24, %s9986_s18  ;;  %p8969_p8 = scmp.lt.s32.totalorder %s9217_s16, 8 }
  0x11   : > { %s9974_s23 = scalar_select %p9296_p7, 1, 0 }
  0x12   : > { %s38_s26 = ssub.s32 %s9288_s22, %s37_s25  ;;  %s9305_s27 = sand.u32 1, %s9197_s11  }
  0x13   : > { %p39_p9 = scmp.eq.s32.totalorder %s38_s26, 0  ;;  %s8954_s28 = smul.u32 384, %s9305_s27 }
  0x14   : > { %p9308_p10 = pnand %p8969_p8, %p50_p6  ;;  %s8568_s3 = smul.u32 6144, %s9288_s22 }
  0x15   : > { %s9313_s30 = scalar_select %p39_p9, %s9197_s11, %s41_s21  }
  0x16   : > { %s138_s4 = scalar_lea.vmem [#allocation2], %s8954_s28  ;;  %s9319_s8 = scalar_lea.hbm %s9970_s0, %s8568_s3 }
  0x17   : > { %s148_s5 = sshll.u32 %s138_s4, 4  ;;  %s135_s9 = scalar_lea.sflag [#allocation3], %s9305_s27  ;;  %s9321_s5 = int_to_ptr.vmem [resolvable:$true] %s148_s5 }
  0x18   : > { %s9087_s17 = scalar_lea.hbm %s9319_s8, 6144  ;;  %p9089_p12 = pneg %p9308_p10 }
  0x19   : > { %p9088_p11 = scmp.ne.s32.totalorder %s9319_s8, %s9087_s17  ;;  %s9092_s24 = scalar_lea.hbm %s9970_s0, 49152 }
  0x1a   : > { %p9093_p1 = scmp.lt.u32.totalorder %s9319_s8, %s9970_s0  ;;  %p9094_p2 = scmp.lt.u32.totalorder %s9092_s24, %s9087_s17 }
  0x1b   : > { %p9090_p13 = pnand %p9089_p12, %p9088_p11  ;;  %p9096_p4 = scmp.lt.u32.totalorder %s9087_s17, %s9319_s8 }
  0x1c   : > { %p9095_p3 = por %p9094_p2, %p9093_p1 }
  0x1d   : > { %p9091_p0 = pneg %p9090_p13 }
  0x1e   : > { %p9097_p5 = por %p9096_p4, %p9095_p3 }
  0x20   : > { %p9098_p6 = pnand %p9097_p5, %p9091_p0 }
  0x22   : > { %9101 = shalt.err (!%p9098_p6)
}
  0x23   : > { %s9102_s28 = scalar_lea.vmem %s9321_s5, 6144  ;;  %s9219_s3 = smov [#allocation2]  }
  0x24   : > { %p9103_p8 = scmp.ne.s32.totalorder %s9321_s5, %s9102_s28  ;;  %s9107_s4 = sshll.u32 %s9219_s3, 4  ;;  %s9108_s4 = int_to_ptr.vmem [resolvable:$false] %s9107_s4 }
  0x25   : > { %s9109_s6 = scalar_lea.vmem %s9108_s4, 12288  ;;  %p9110_p13 = scmp.lt.s32.totalorder %s9321_s5, %s9108_s4 }
  0x26   : > { %p9105_p9 = pnand %p9103_p8, %p9089_p12  ;;  %p9111_p1 = scmp.lt.s32.totalorder %s9109_s6, %s9102_s28 }
  0x28   : > { %p9106_p11 = pneg %p9105_p9  ;;  %p9112_p2 = por %p9111_p1, %p9110_p13 }
  0x2a   : > { %p9113_p3 = pnand %p9112_p2, %p9106_p11 }
  0x2c   : > { %9116 = shalt.err (!%p9113_p3)
}
  0x2d   : > { %8965 = dma.hbm_to_vmem [thread:$0]  (!%p9308_p10), %s9319_s8, 6144, %s9321_s5, %s135_s9  }
  0x2e   : > { %s8955_s7 = smul.u32 3072, %s9305_s27  ;;  %p8563_p0 = scmp.ge.s32.totalorder %s9217_s16, 1 }
  0x2f   : > { %s8569_s17 = smul.u32 24576, %s9288_s22  ;;  %p176_p4 = scmp.lt.s32.totalorder %s9217_s16, 9 }
  0x30   : > { %s159_s25 = scalar_lea.vmem [#allocation4], %s8955_s7  ;;  %s156_s22 = scalar_lea.sflag [#allocation5], %s9305_s27 }
  0x31   : > { %s9356_s24 = scalar_lea.hbm %s9971_s1, %s8569_s17  ;;  %s168_s26 = sshll.u32 %s159_s25, 4  ;;  %s9362_s26 = int_to_ptr.vmem [resolvable:$true] %s168_s26 }
  0x32   : > { %p9358_p5 = pnand %p8563_p0, %p176_p4  ;;  %s9117_s5 = scalar_lea.hbm %s9356_s24, 49152 }
  0x33   : > { %p9118_p6 = scmp.ne.s32.totalorder %s9356_s24, %s9117_s5  ;;  %s9122_s3 = scalar_lea.hbm %s9971_s1, 393216 }
  0x34   : > { %p9123_p11 = scmp.lt.u32.totalorder %s9356_s24, %s9971_s1  ;;  %p9124_p13 = scmp.lt.u32.totalorder %s9122_s3, %s9117_s5 }
  0x35   : > { %p9120_p8 = pnand %p9118_p6, %p9089_p12  ;;  %p9126_p2 = scmp.lt.u32.totalorder %s9117_s5, %s9356_s24 }
  0x36   : > { %p9125_p1 = por %p9124_p13, %p9123_p11 }
  0x37   : > { %p9121_p9 = pneg %p9120_p8 }
  0x38   : > { %p9127_p3 = por %p9126_p2, %p9125_p1 }
  0x3a   : > { %p9128_p0 = pnand %p9127_p3, %p9121_p9 }
  0x3c   : > { %9131 = shalt.err (!%p9128_p0)
}
  0x3d   : > { %s9132_s7 = scalar_lea.vmem %s9362_s26, 49152  ;;  %s9220_s17 = smov [#allocation4]  }
  0x3e   : > { %p9133_p4 = scmp.ne.s32.totalorder %s9362_s26, %s9132_s7  ;;  %s9137_s20 = sshll.u32 %s9220_s17, 4  ;;  %s9138_s20 = int_to_ptr.vmem [resolvable:$false] %s9137_s20 }
  0x3f   : > { %s9139_s21 = scalar_lea.vmem %s9138_s20, 98304  ;;  %p9140_p7 = scmp.lt.s32.totalorder %s9362_s26, %s9138_s20 }
  0x40   : > { %p9135_p6 = pnand %p9133_p4, %p9089_p12  ;;  %p9141_p11 = scmp.lt.s32.totalorder %s9139_s21, %s9132_s7 }
  0x42   : > { %p9136_p8 = pneg %p9135_p6  ;;  %p9142_p13 = por %p9141_p11, %p9140_p7 }
  0x44   : > { %p9143_p1 = pnand %p9142_p13, %p9136_p8 }
  0x46   : > { %9146 = shalt.err (!%p9143_p1)
}
  0x47   : > { %s9221_s25 = smov 196608   ;;  %s9222_s5 = smov 24576  }
  0x48   : > { %s9223_s8 = smov 1536   ;;  %180 = sbr.rel (%p9358_p5) target bundleno = 700 (0x2bc), region = 28 }
  0x49   : > { %8968 = dma.hbm_to_vmem [thread:$0]  (!%p9308_p10), %s9356_s24, 49152, %s9362_s26, %s156_s22, %s9221_s25, %s9222_s5, %s9223_s8  }
  0x4a   : > { %s182_s9 = sand.u32 (!%p9358_p5), 1, %s9193_s10   ;;  %p9977_p7 = scmp.ne.s32.totalorder (!%p9358_p5), %s9974_s23, 0 }
  0x4b   : > { %s8956_s3 = smul.u32 (!%p9358_p5), 384, %s182_s9  ;;  %s183_s4 = scalar_lea.sflag (!%p9358_p5), [#allocation3], %s182_s9 }
  0x4d   : > { %s9393_s6 = scalar_lea.vmem (!%p9358_p5), [#allocation2], %s8956_s3 }
  0x4f   : > { %9180 = dma.done.wait (%p9977_p7), %s183_s4, 6144  }
  0x50   : > { %9182 = vsyncadd (%p9977_p7), %s183_s4, 4294961152  ;;  %s8957_s7 = smul.u32 3072, %s182_s9  ;;  %s192_s29 = scalar_lea.sflag [#allocation5], %s182_s9 }
  0x52   : > { %s9399_s27 = scalar_lea.vmem [#allocation4], %s8957_s7 }
  0x53   : > { %9184 = dma.done.wait (%p9977_p7), %s192_s29, 49152  }
  0x54   : > { %9186 = vsyncadd (%p9977_p7), %s192_s29, 4294918144  ;;  %p226_p10 = scmp.lt.s32.totalorder %s9205_s13, 1  ;;  %p8565_p12 = scmp.ne.s32.totalorder %s9201_s12, 0 }
  0x55   : > { %vm234_vm0 = vcmask (!%p8565_p12), 74752   ;;  %v9224_v0 = vmov (!%p8565_p12), 0.0  }
  0x56   : > { %s9992_s13 = smov (!%p226_p10, %s9205_s13), 1  ;;  %233 = sbr.rel (%p8565_p12) target bundleno = 93 (0x5d), region = 40 }
  0x57   : > { %s8564_s24 = sshll.u32 %s9992_s13, 1 }
  0x58   : > { %s9410_s22 = scalar_lea.vmem %s9972_s2, %s8564_s24 }
  0x59   : > { %235 = vst.msk [vmem:[%s9410_s22] sm:$0x3] (!%p8565_p12), %vm234_vm0, %v9224_v0 }
  0x5d PF: > { %v286_v1 = vld [vmem:[%s9399_s27 + $0x8] sm:$0xff]  ;;  %v285_v3 = vld [vmem:[%s9399_s27] sm:$0xff]  ;;  %v721_v4 = vlaneseq  ;;  %v288_v7 = vld [vmem:[%s9399_s27 + $0x18] sm:$0xff]  ;;  %v9225_v9 = vmov 1983009808   ;;  %vm8446_vm1 = vcmask 74752  }
  0x5e   : > { %v478_v2 = vld [vmem:[%s9399_s27 + $0x608] sm:$0x3]  ;;  %v477_v6 = vld [vmem:[%s9399_s27 + $0x600] sm:$0x3]  ;;  %v480_v8 = vld [vmem:[%s9399_s27 + $0x618] sm:$0x3]  ;;  %v719_v10 = vunpack.c.l.s4 %v9225_v9 }
  0x5f   : > { %v8570_v5 = vpack.c.bf16 %v478_v2, %v286_v1  ;;  %v8572_v11 = vpack.c.bf16 %v477_v6, %v285_v3  ;;  %v8574_v12 = vpack.c.bf16 %v480_v8, %v288_v7  ;;  %v287_v13 = vld [vmem:[%s9399_s27 + $0x10] sm:$0xff]  ;;  %v237_v15 = vld [vmem:[%s9393_s6] sm:$0xff]  ;;  %v722_v16 = vshrl.u32 %v721_v4, 7  ;;  %v290_v20 = vld [vmem:[%s9399_s27 + $0x28] sm:$0xff] }
  0x60   : > { %v479_v14 = vld [vmem:[%s9399_s27 + $0x610] sm:$0x3]  ;;  %v720_v18 = vunpack.c.0.s8 %v719_v10  ;;  %v717_v19 = vcombine.high %v237_v15, %v237_v15  ;;  %v482_v21 = vld [vmem:[%s9399_s27 + $0x628] sm:$0x3]  ;;  %v292_v23 = vld [vmem:[%s9399_s27 + $0x38] sm:$0xff] }
  0x61   : > { %8571 = vmatprep.subr.bf16.mxu0 %v8570_v5  ;;  %v8576_v17 = vpack.c.bf16 %v479_v14, %v287_v13  ;;  %8575 = vmatprep.subr.bf16.mxu1 %v8574_v12  ;;  %v8578_v22 = vpack.c.bf16 %v482_v21, %v290_v20  ;;  %v484_v24 = vld [vmem:[%s9399_s27 + $0x638] sm:$0x3]  ;;  %v289_v26 = vld [vmem:[%s9399_s27 + $0x20] sm:$0xff]  ;;  %v238_v28 = vld [vmem:[%s9393_s6 + $0x8] sm:$0xff] }
  0x62   : > { %8573 = vmatpush1.bf16.xpose.msra.mxu0 %v8572_v11  ;;  %v9427_v25 = vsub.s32 %v720_v18, %v722_v16  ;;  %v8582_v27 = vpack.c.bf16 %v484_v24, %v292_v23  ;;  %v481_v29 = vld [vmem:[%s9399_s27 + $0x620] sm:$0x3]  ;;  %v291_v30 = vld [vmem:[%s9399_s27 + $0x30] sm:$0xff]  ;;  %v734_v32 = vcombine.high %v238_v28, %v238_v28  ;;  %v294_v36 = vld [vmem:[%s9399_s27 + $0x48] sm:$0xff] }
  0x63   : > { %8577 = vmatpush1.bf16.xpose.msra.mxu1 %v8576_v17  ;;  %8579 = vmatprep.subr.bf16.mxu0 %v8578_v22  ;;  %v483_v31 = vld [vmem:[%s9399_s27 + $0x630] sm:$0x3]  ;;  %v486_v37 = vld [vmem:[%s9399_s27 + $0x648] sm:$0x3]  ;;  %v296_v39 = vld [vmem:[%s9399_s27 + $0x58] sm:$0xff]  ;;  %v8580_v44 = vpack.c.bf16 %v481_v29, %v289_v26 }
  0x64   : > { %v724_v33 = vrot.slane %v237_v15, %v9427_v25  ;;  %v731_v34 = vrot.slane %v717_v19, %v9427_v25  ;;  %8583 = vmatprep.subr.bf16.mxu1 %v8582_v27  ;;  %v741_v35 = vrot.slane %v238_v28, %v9427_v25  ;;  %v748_v38 = vrot.slane %v734_v32, %v9427_v25  ;;  %v488_v40 = vld [vmem:[%s9399_s27 + $0x658] sm:$0x3]  ;;  %v239_v41 = vld [vmem:[%s9393_s6 + $0x10] sm:$0xff]  ;;  %v293_v51 = vld [vmem:[%s9399_s27 + $0x40] sm:$0xff] }
  0x65   : > { %v8584_v45 = vpack.c.bf16 %v483_v31, %v291_v30  ;;  %v8586_v47 = vpack.c.bf16 %v486_v37, %v294_v36  ;;  %v8590_v49 = vpack.c.bf16 %v488_v40, %v296_v39  ;;  %v751_v50 = vcombine.high %v239_v41, %v239_v41  ;;  %v485_v52 = vld [vmem:[%s9399_s27 + $0x640] sm:$0x3]  ;;  %v295_v53 = vld [vmem:[%s9399_s27 + $0x50] sm:$0xff]  ;;  %v298_v56 = vld [vmem:[%s9399_s27 + $0x68] sm:$0xff] }
  0x66   : > { %v732_v42 = vcombine.high %v724_v33, %v724_v33  ;;  %v733_v43 = vcombine.high %v731_v34, %v731_v34  ;;  %v749_v46 = vcombine.high %v741_v35, %v741_v35  ;;  %v750_v48 = vcombine.high %v748_v38, %v748_v38  ;;  %v487_v54 = vld [vmem:[%s9399_s27 + $0x650] sm:$0x3]  ;;  %v490_v57 = vld [vmem:[%s9399_s27 + $0x668] sm:$0x3]  ;;  %v300_v59 = vld [vmem:[%s9399_s27 + $0x78] sm:$0xff] }
  0x67   : > { %v758_v55 = vrot.slane %v239_v41, %v9427_v25  ;;  %v765_v58 = vrot.slane %v751_v50, %v9427_v25  ;;  %v492_v60 = vld [vmem:[%s9399_s27 + $0x678] sm:$0x3]  ;;  %v8588_v62 = vpack.c.bf16 %v485_v52, %v293_v51  ;;  %v8592_v63 = vpack.c.bf16 %v487_v54, %v295_v53  ;;  %v297_v5 = vld [vmem:[%s9399_s27 + $0x60] sm:$0xff]  ;;  %v299_v7 = vld [vmem:[%s9399_s27 + $0x70] sm:$0xff] }
  0x68   : > { %1789 = vmatprep.mubr.f32.mxu0 %v732_v42  ;;  %1859 = vmatprep.mubr.f32.mxu1 %v733_v43  ;;  %v240_v61 = vld [vmem:[%s9393_s6 + $0x18] sm:$0xff]  ;;  %v8594_v1 = vpack.c.bf16 %v490_v57, %v298_v56  ;;  %v8598_v3 = vpack.c.bf16 %v492_v60, %v300_v59  ;;  %v489_v6 = vld [vmem:[%s9399_s27 + $0x660] sm:$0x3]  ;;  %v491_v8 = vld [vmem:[%s9399_s27 + $0x670] sm:$0x3] }
  0x69   : > { %1790 = vmatmul.mubr.f32.vlgmr.msra.gmra.mrb[0].mxu0 %v724_v33  ;;  %v766_v0 = vcombine.high %v758_v55, %v758_v55  ;;  %v767_v2 = vcombine.high %v765_v58, %v765_v58  ;;  %v768_v4 = vcombine.high %v240_v61, %v240_v61  ;;  %v775_v9 = vrot.slane %v240_v61, %v9427_v25  ;;  %v302_v10 = vld [vmem:[%s9399_s27 + $0x88] sm:$0xff]  ;;  %v304_v13 = vld [vmem:[%s9399_s27 + $0x98] sm:$0xff]  ;;  %v241_v15 = vld [vmem:[%s9393_s6 + $0x20] sm:$0xff] }
  0x6a   : > { %1860 = vmatmul.mubr.f32.vlgmr.msra.gmra.mrb[0].mxu1 %v731_v34  ;;  %8581 = vmatpush1.bf16.xpose.msra.mxu0 %v8580_v44  ;;  %v494_v11 = vld [vmem:[%s9399_s27 + $0x688] sm:$0x3]  ;;  %v496_v14 = vld [vmem:[%s9399_s27 + $0x698] sm:$0x3]  ;;  %v8596_v16 = vpack.c.bf16 %v489_v6, %v297_v5  ;;  %v8600_v17 = vpack.c.bf16 %v491_v8, %v299_v7  ;;  %v785_v22 = vcombine.high %v241_v15, %v241_v15  ;;  %v301_v23 = vld [vmem:[%s9399_s27 + $0x80] sm:$0xff] }
  0x6b   : > { %8585 = vmatpush1.bf16.xpose.msra.mxu1 %v8584_v45  ;;  %1929 = vmatprep.mubr.f32.mxu0 %v749_v46  ;;  %v782_v12 = vrot.slane %v768_v4, %v9427_v25  ;;  %v783_v18 = vcombine.high %v775_v9, %v775_v9  ;;  %v8602_v19 = vpack.c.bf16 %v494_v11, %v302_v10  ;;  %v493_v24 = vld [vmem:[%s9399_s27 + $0x680] sm:$0x3]  ;;  %v303_v26 = vld [vmem:[%s9399_s27 + $0x90] sm:$0xff]  ;;  %v306_v29 = vld [vmem:[%s9399_s27 + $0xa8] sm:$0xff] }
  0x6c   : > { %8587 = vmatprep.subr.bf16.mxu0 %v8586_v47  ;;  %1999 = vmatprep.mubr.f32.mxu1 %v750_v48  ;;  %v8606_v21 = vpack.c.bf16 %v496_v14, %v304_v13  ;;  %v495_v27 = vld [vmem:[%s9399_s27 + $0x690] sm:$0x3]  ;;  %v792_v28 = vrot.slane %v241_v15, %v9427_v25  ;;  %v498_v30 = vld [vmem:[%s9399_s27 + $0x6a8] sm:$0x3]  ;;  %v799_v31 = vrot.slane %v785_v22, %v9427_v25  ;;  %v308_v32 = vld [vmem:[%s9399_s27 + $0xb8] sm:$0xff] }
  0x6d   : > { %8591 = vmatprep.subr.bf16.mxu1 %v8590_v49  ;;  %v784_v20 = vcombine.high %v782_v12, %v782_v12  ;;  %v500_v33 = vld [vmem:[%s9399_s27 + $0x6b8] sm:$0x3]  ;;  %v242_v34 = vld [vmem:[%s9393_s6 + $0x28] sm:$0xff]  ;;  %v8608_v36 = vpack.c.bf16 %v495_v27, %v303_v26  ;;  %v305_v42 = vld [vmem:[%s9399_s27 + $0xa0] sm:$0xff] }
  0x6e   : > { %v800_v37 = vcombine.high %v792_v28, %v792_v28  ;;  %v801_v39 = vcombine.high %v799_v31, %v799_v31  ;;  %v8614_v40 = vpack.c.bf16 %v500_v33, %v308_v32  ;;  %v802_v41 = vcombine.high %v242_v34, %v242_v34  ;;  %v497_v43 = vld [vmem:[%s9399_s27 + $0x6a0] sm:$0x3]  ;;  %v307_v44 = vld [vmem:[%s9399_s27 + $0xb0] sm:$0xff]  ;;  %v310_v47 = vld [vmem:[%s9399_s27 + $0xc8] sm:$0xff] }
  0x6f   : > { %v499_v45 = vld [vmem:[%s9399_s27 + $0x6b0] sm:$0x3]  ;;  %v809_v46 = vrot.slane %v242_v34, %v9427_v25  ;;  %v502_v48 = vld [vmem:[%s9399_s27 + $0x6c8] sm:$0x3]  ;;  %v312_v50 = vld [vmem:[%s9399_s27 + $0xd8] sm:$0xff]  ;;  %v8612_v53 = vpack.c.bf16 %v497_v43, %v305_v42 }
  0x70   : > { %v816_v49 = vrot.slane %v802_v41, %v9427_v25  ;;  %v504_v51 = vld [vmem:[%s9399_s27 + $0x6d8] sm:$0x3]  ;;  %v243_v52 = vld [vmem:[%s9393_s6 + $0x30] sm:$0xff]  ;;  %v8616_v54 = vpack.c.bf16 %v499_v45, %v307_v44  ;;  %v8618_v56 = vpack.c.bf16 %v502_v48, %v310_v47  ;;  %v309_v60 = vld [vmem:[%s9399_s27 + $0xc0] sm:$0xff] }
  0x71   : > { %1930 = vmatmul.mubr.f32.vlgmr.msra.gmra.mrb[2].mxu0 %v741_v35  ;;  %v8604_v35 = vpack.c.bf16 %v493_v24, %v301_v23  ;;  %v819_v59 = vcombine.high %v243_v52, %v243_v52  ;;  %v501_v61 = vld [vmem:[%s9399_s27 + $0x6c0] sm:$0x3]  ;;  %v316_v4 = vld [vmem:[%s9399_s27 + $0xf8] sm:$0xff]  ;;  %v246_v43 = vld [vmem:[%s9393_s6 + $0x48] sm:$0xff] }
  0x72   : > { %2000 = vmatmul.mubr.f32.vlgmr.msra.gmra.mrb[2].mxu1 %v748_v38  ;;  %8589 = vmatpush1.bf16.xpose.msra.mxu0 %v8588_v62  ;;  %v8610_v38 = vpack.c.bf16 %v498_v30, %v306_v29  ;;  %v818_v57 = vcombine.high %v816_v49, %v816_v49  ;;  %v311_v62 = vld [vmem:[%s9399_s27 + $0xd0] sm:$0xff]  ;;  %v508_v5 = vld [vmem:[%s9399_s27 + $0x6f8] sm:$0x3]  ;;  %v8620_v7 = vpack.c.bf16 %v501_v61, %v309_v60  ;;  %v313_v14 = vld [vmem:[%s9399_s27 + $0xe0] sm:$0xff] }
  0x73   : > { %8593 = vmatpush1.bf16.xpose.msra.mxu1 %v8592_v63  ;;  %2069 = vmatprep.mubr.f32.mxu0 %v766_v0  ;;  %v503_v63 = vld [vmem:[%s9399_s27 + $0x6d0] sm:$0x3]  ;;  %v826_v0 = vrot.slane %v243_v52, %v9427_v25  ;;  %v244_v6 = vld [vmem:[%s9393_s6 + $0x38] sm:$0xff]  ;;  %v505_v15 = vld [vmem:[%s9399_s27 + $0x6e0] sm:$0x3] }
  0x74   : > { %8595 = vmatprep.subr.bf16.mxu0 %v8594_v1  ;;  %2139 = vmatprep.mubr.f32.mxu1 %v767_v2  ;;  %v314_v1 = vld [vmem:[%s9399_s27 + $0xe8] sm:$0xff]  ;;  %v8624_v8 = vpack.c.bf16 %v503_v63, %v311_v62  ;;  %v836_v13 = vcombine.high %v244_v6, %v244_v6  ;;  %v320_v22 = vld [vmem:[%s9399_s27 + $0x118] sm:$0xff]  ;;  %v245_v24 = vld [vmem:[%s9393_s6 + $0x40] sm:$0xff]  ;;  %v8628_v26 = vpack.c.bf16 %v505_v15, %v313_v14 }
  0x75   : > { %8599 = vmatprep.subr.bf16.mxu1 %v8598_v3  ;;  %v506_v2 = vld [vmem:[%s9399_s27 + $0x6e8] sm:$0x3]  ;;  %v833_v3 = vrot.slane %v819_v59, %v9427_v25  ;;  %v512_v23 = vld [vmem:[%s9399_s27 + $0x718] sm:$0x3]  ;;  %v853_v32 = vcombine.high %v245_v24, %v245_v24  ;;  %v317_v33 = vld [vmem:[%s9399_s27 + $0x100] sm:$0xff] }
  0x76   : > { %v8626_v10 = vpack.c.bf16 %v506_v2, %v314_v1  ;;  %v509_v34 = vld [vmem:[%s9399_s27 + $0x700] sm:$0x3]  ;;  %v324_v41 = vld [vmem:[%s9399_s27 + $0x138] sm:$0xff]  ;;  %v247_v61 = vld [vmem:[%s9393_s6 + $0x50] sm:$0xff] }
  0x77   : > { %v835_v11 = vcombine.high %v833_v3, %v833_v3  ;;  %v516_v42 = vld [vmem:[%s9399_s27 + $0x738] sm:$0x3]  ;;  %v8636_v44 = vpack.c.bf16 %v509_v34, %v317_v33  ;;  %v513_v52 = vld [vmem:[%s9399_s27 + $0x720] sm:$0x3] }
  0x78   : > { %v328_v59 = vld [vmem:[%s9399_s27 + $0x158] sm:$0xff]  ;;  %v249_v34 = vld [vmem:[%s9393_s6 + $0x60] sm:$0xff] }
  0x79   : > { %2070 = vmatmul.mubr.f32.vlgmr.msra.gmra.mrb[4].mxu0 %v758_v55  ;;  %v817_v55 = vcombine.high %v809_v46, %v809_v46  ;;  %v520_v60 = vld [vmem:[%s9399_s27 + $0x758] sm:$0x3] }
  0x7a   : > { %2140 = vmatmul.mubr.f32.vlgmr.msra.gmra.mrb[4].mxu1 %v765_v58  ;;  %8597 = vmatpush1.bf16.xpose.msra.mxu0 %v8596_v16  ;;  %v8622_v58 = vpack.c.bf16 %v504_v51, %v312_v50  ;;  %v315_v16 = vld [vmem:[%s9399_s27 + $0xf0] sm:$0xff]  ;;  %v870_v50 = vcombine.high %v246_v43, %v246_v43  ;;  %v321_v51 = vld [vmem:[%s9399_s27 + $0x120] sm:$0xff]  ;;  %v524_v14 = vld [vmem:[%s9399_s27 + $0x778] sm:$0x3] }
  0x7b   : > { %8601 = vmatpush1.bf16.xpose.msra.mxu1 %v8600_v17  ;;  %2209 = vmatprep.mubr.f32.mxu0 %v783_v18  ;;  %v507_v17 = vld [vmem:[%s9399_s27 + $0x6f0] sm:$0x3]  ;;  %v843_v18 = vrot.slane %v244_v6, %v9427_v25  ;;  %v8644_v62 = vpack.c.bf16 %v513_v52, %v321_v51  ;;  %v517_v6 = vld [vmem:[%s9399_s27 + $0x740] sm:$0x3]  ;;  %v248_v15 = vld [vmem:[%s9393_s6 + $0x58] sm:$0xff] }
  0x7c   : > { %8603 = vmatprep.subr.bf16.mxu0 %v8602_v19  ;;  %2279 = vmatprep.mubr.f32.mxu1 %v784_v20  ;;  %v318_v19 = vld [vmem:[%s9399_s27 + $0x108] sm:$0xff]  ;;  %v8632_v27 = vpack.c.bf16 %v507_v17, %v315_v16  ;;  %v528_v33 = vld [vmem:[%s9399_s27 + $0x798] sm:$0x3] }
  0x7d   : > { %8607 = vmatprep.subr.bf16.mxu1 %v8606_v21  ;;  %v510_v20 = vld [vmem:[%s9399_s27 + $0x708] sm:$0x3]  ;;  %v850_v21 = vrot.slane %v836_v13, %v9427_v25  ;;  %v332_v13 = vld [vmem:[%s9399_s27 + $0x178] sm:$0xff] }
  0x7e   : > { %v8634_v29 = vpack.c.bf16 %v510_v20, %v318_v19  ;;  %v532_v51 = vld [vmem:[%s9399_s27 + $0x7b8] sm:$0x3]  ;;  %v250_v52 = vld [vmem:[%s9393_s6 + $0x68] sm:$0xff] }
  0x7f   : > { %v852_v30 = vcombine.high %v850_v21, %v850_v21 }
  0x81   : > { %2210 = vmatmul.mubr.f32.vlgmr.msra.gmra.mrb[6].mxu0 %v775_v9  ;;  %v834_v9 = vcombine.high %v826_v0, %v826_v0 }
  0x82   : > { %2280 = vmatmul.mubr.f32.vlgmr.msra.gmra.mrb[6].mxu1 %v782_v12  ;;  %8605 = vmatpush1.bf16.xpose.msra.mxu0 %v8604_v35  ;;  %v8630_v12 = vpack.c.bf16 %v508_v5, %v316_v4  ;;  %v319_v35 = vld [vmem:[%s9399_s27 + $0x110] sm:$0xff]  ;;  %v887_v4 = vcombine.high %v247_v61, %v247_v61  ;;  %v325_v5 = vld [vmem:[%s9399_s27 + $0x140] sm:$0xff] }
  0x83   : > { %8609 = vmatpush1.bf16.xpose.msra.mxu1 %v8608_v36  ;;  %2349 = vmatprep.mubr.f32.mxu0 %v800_v37  ;;  %v511_v36 = vld [vmem:[%s9399_s27 + $0x710] sm:$0x3]  ;;  %v860_v37 = vrot.slane %v245_v24, %v9427_v25  ;;  %v8652_v16 = vpack.c.bf16 %v517_v6, %v325_v5  ;;  %v521_v24 = vld [vmem:[%s9399_s27 + $0x760] sm:$0x3]  ;;  %v536_v5 = vld [vmem:[%s9399_s27 + $0x7d8] sm:$0x3] }
  0x84   : > { %8611 = vmatprep.subr.bf16.mxu0 %v8610_v38  ;;  %2419 = vmatprep.mubr.f32.mxu1 %v801_v39  ;;  %v322_v38 = vld [vmem:[%s9399_s27 + $0x128] sm:$0xff]  ;;  %v8640_v45 = vpack.c.bf16 %v511_v36, %v319_v35  ;;  %v251_v6 = vld [vmem:[%s9393_s6 + $0x70] sm:$0xff] }
  0x85   : > { %8615 = vmatprep.subr.bf16.mxu1 %v8614_v40  ;;  %v514_v39 = vld [vmem:[%s9399_s27 + $0x728] sm:$0x3]  ;;  %v867_v40 = vrot.slane %v853_v32, %v9427_v25  ;;  %v336_v32 = vld [vmem:[%s9399_s27 + $0x198] sm:$0xff] }
  0x86   : > { %v8642_v47 = vpack.c.bf16 %v514_v39, %v322_v38 }
  0x87   : > { %v869_v48 = vcombine.high %v867_v40, %v867_v40 }
  0x89   : > { %2350 = vmatmul.mubr.f32.vlgmr.msra.gmra.mrb[8].mxu0 %v792_v28  ;;  %v851_v28 = vcombine.high %v843_v18, %v843_v18 }
  0x8a   : > { %2420 = vmatmul.mubr.f32.vlgmr.msra.gmra.mrb[8].mxu1 %v799_v31  ;;  %8613 = vmatpush1.bf16.xpose.msra.mxu0 %v8612_v53  ;;  %v8638_v31 = vpack.c.bf16 %v512_v23, %v320_v22  ;;  %v323_v53 = vld [vmem:[%s9399_s27 + $0x130] sm:$0xff]  ;;  %v904_v22 = vcombine.high %v248_v15, %v248_v15  ;;  %v329_v23 = vld [vmem:[%s9399_s27 + $0x160] sm:$0xff] }
  0x8b   : > { %8617 = vmatpush1.bf16.xpose.msra.mxu1 %v8616_v54  ;;  %2489 = vmatprep.mubr.f32.mxu0 %v817_v55  ;;  %v515_v54 = vld [vmem:[%s9399_s27 + $0x730] sm:$0x3]  ;;  %v877_v55 = vrot.slane %v246_v43, %v9427_v25  ;;  %v8660_v35 = vpack.c.bf16 %v521_v24, %v329_v23  ;;  %v525_v43 = vld [vmem:[%s9399_s27 + $0x780] sm:$0x3]  ;;  %v540_v23 = vld [vmem:[%s9399_s27 + $0x7f8] sm:$0x3] }
  0x8c   : > { %8619 = vmatprep.subr.bf16.mxu0 %v8618_v56  ;;  %2559 = vmatprep.mubr.f32.mxu1 %v818_v57  ;;  %v326_v56 = vld [vmem:[%s9399_s27 + $0x148] sm:$0xff]  ;;  %v8648_v63 = vpack.c.bf16 %v515_v54, %v323_v53  ;;  %v252_v24 = vld [vmem:[%s9393_s6 + $0x78] sm:$0xff] }
  0x8d   : > { %8623 = vmatprep.subr.bf16.mxu1 %v8622_v58  ;;  %v518_v57 = vld [vmem:[%s9399_s27 + $0x748] sm:$0x3]  ;;  %v884_v58 = vrot.slane %v870_v50, %v9427_v25  ;;  %v340_v50 = vld [vmem:[%s9399_s27 + $0x1b8] sm:$0xff] }
  0x8e   : > { %v8650_v1 = vpack.c.bf16 %v518_v57, %v326_v56 }
  0x8f   : > { %v886_v2 = vcombine.high %v884_v58, %v884_v58 }
  0x91   : > { %2490 = vmatmul.mubr.f32.vlgmr.msra.gmra.mrb[10].mxu0 %v809_v46  ;;  %v868_v46 = vcombine.high %v860_v37, %v860_v37 }
  0x92   : > { %2560 = vmatmul.mubr.f32.vlgmr.msra.gmra.mrb[10].mxu1 %v816_v49  ;;  %8621 = vmatpush1.bf16.xpose.msra.mxu0 %v8620_v7  ;;  %v8646_v49 = vpack.c.bf16 %v516_v42, %v324_v41  ;;  %v327_v7 = vld [vmem:[%s9399_s27 + $0x150] sm:$0xff]  ;;  %v921_v41 = vcombine.high %v249_v34, %v249_v34  ;;  %v333_v42 = vld [vmem:[%s9399_s27 + $0x180] sm:$0xff] }
  0x93   : > { %8625 = vmatpush1.bf16.xpose.msra.mxu1 %v8624_v8  ;;  %2629 = vmatprep.mubr.f32.mxu0 %v834_v9  ;;  %v519_v8 = vld [vmem:[%s9399_s27 + $0x750] sm:$0x3]  ;;  %v894_v9 = vrot.slane %v247_v61, %v9427_v25  ;;  %v8668_v53 = vpack.c.bf16 %v525_v43, %v333_v42  ;;  %v529_v61 = vld [vmem:[%s9399_s27 + $0x7a0] sm:$0x3]  ;;  %v544_v42 = vld [vmem:[%s9399_s27 + $0x818] sm:$0x3] }
  0x94   : > { %8627 = vmatprep.subr.bf16.mxu0 %v8626_v10  ;;  %2699 = vmatprep.mubr.f32.mxu1 %v835_v11  ;;  %v330_v10 = vld [vmem:[%s9399_s27 + $0x168] sm:$0xff]  ;;  %v8656_v17 = vpack.c.bf16 %v519_v8, %v327_v7  ;;  %v253_v43 = vld [vmem:[%s9393_s6 + $0x80] sm:$0xff] }
  0x95   : > { %8631 = vmatprep.subr.bf16.mxu1 %v8630_v12  ;;  %v522_v11 = vld [vmem:[%s9399_s27 + $0x768] sm:$0x3]  ;;  %v901_v12 = vrot.slane %v887_v4, %v9427_v25  ;;  %v344_v4 = vld [vmem:[%s9399_s27 + $0x1d8] sm:$0xff] }
  0x96   : > { %v8658_v19 = vpack.c.bf16 %v522_v11, %v330_v10 }
  0x97   : > { %v903_v20 = vcombine.high %v901_v12, %v901_v12 }
  0x99   : > { %2630 = vmatmul.mubr.f32.vlgmr.msra.gmra.mrb[12].mxu0 %v826_v0  ;;  %v885_v0 = vcombine.high %v877_v55, %v877_v55 }
  0x9a   : > { %2700 = vmatmul.mubr.f32.vlgmr.msra.gmra.mrb[12].mxu1 %v833_v3  ;;  %8629 = vmatpush1.bf16.xpose.msra.mxu0 %v8628_v26  ;;  %v8654_v3 = vpack.c.bf16 %v520_v60, %v328_v59  ;;  %v331_v26 = vld [vmem:[%s9399_s27 + $0x170] sm:$0xff]  ;;  %v938_v59 = vcombine.high %v250_v52, %v250_v52  ;;  %v337_v60 = vld [vmem:[%s9399_s27 + $0x1a0] sm:$0xff] }
  0x9b   : > { %8633 = vmatpush1.bf16.xpose.msra.mxu1 %v8632_v27  ;;  %2769 = vmatprep.mubr.f32.mxu0 %v851_v28  ;;  %v523_v27 = vld [vmem:[%s9399_s27 + $0x770] sm:$0x3]  ;;  %v911_v28 = vrot.slane %v248_v15, %v9427_v25  ;;  %v8676_v7 = vpack.c.bf16 %v529_v61, %v337_v60  ;;  %v533_v15 = vld [vmem:[%s9399_s27 + $0x7c0] sm:$0x3]  ;;  %v548_v60 = vld [vmem:[%s9399_s27 + $0x838] sm:$0x3] }
  0x9c   : > { %8635 = vmatprep.subr.bf16.mxu0 %v8634_v29  ;;  %2839 = vmatprep.mubr.f32.mxu1 %v852_v30  ;;  %v334_v29 = vld [vmem:[%s9399_s27 + $0x188] sm:$0xff]  ;;  %v8664_v36 = vpack.c.bf16 %v523_v27, %v331_v26 }
  0x9d   : > { %8639 = vmatprep.subr.bf16.mxu1 %v8638_v31  ;;  %v526_v30 = vld [vmem:[%s9399_s27 + $0x788] sm:$0x3]  ;;  %v918_v31 = vrot.slane %v904_v22, %v9427_v25  ;;  %v348_v22 = vld [vmem:[%s9399_s27 + $0x1f8] sm:$0xff] }
  0x9e   : > { %v8666_v38 = vpack.c.bf16 %v526_v30, %v334_v29  ;;  %v254_v61 = vld [vmem:[%s9393_s6 + $0x88] sm:$0xff] }
  0x9f   : > { %v920_v39 = vcombine.high %v918_v31, %v918_v31 }
  0xa1   : > { %2770 = vmatmul.mubr.f32.vlgmr.msra.gmra.mrb[14].mxu0 %v843_v18  ;;  %v902_v18 = vcombine.high %v894_v9, %v894_v9 }
  0xa2   : > { %2840 = vmatmul.mubr.f32.vlgmr.msra.gmra.mrb[14].mxu1 %v850_v21  ;;  %8637 = vmatpush1.bf16.xpose.msra.mxu0 %v8636_v44  ;;  %v8662_v21 = vpack.c.bf16 %v524_v14, %v332_v13  ;;  %v335_v44 = vld [vmem:[%s9399_s27 + $0x190] sm:$0xff]  ;;  %v955_v13 = vcombine.high %v251_v6, %v251_v6  ;;  %v341_v14 = vld [vmem:[%s9399_s27 + $0x1c0] sm:$0xff] }
  0xa3   : > { %8641 = vmatpush1.bf16.xpose.msra.mxu1 %v8640_v45  ;;  %2909 = vmatprep.mubr.f32.mxu0 %v868_v46  ;;  %v527_v45 = vld [vmem:[%s9399_s27 + $0x790] sm:$0x3]  ;;  %v928_v46 = vrot.slane %v249_v34, %v9427_v25  ;;  %v8684_v26 = vpack.c.bf16 %v533_v15, %v341_v14  ;;  %v537_v34 = vld [vmem:[%s9399_s27 + $0x7e0] sm:$0x3]  ;;  %v552_v14 = vld [vmem:[%s9399_s27 + $0x858] sm:$0x3] }
  0xa4   : > { %8643 = vmatprep.subr.bf16.mxu0 %v8642_v47  ;;  %2979 = vmatprep.mubr.f32.mxu1 %v869_v48  ;;  %v338_v47 = vld [vmem:[%s9399_s27 + $0x1a8] sm:$0xff]  ;;  %v8672_v54 = vpack.c.bf16 %v527_v45, %v335_v44  ;;  %v255_v15 = vld [vmem:[%s9393_s6 + $0x90] sm:$0xff] }
  0xa5   : > { %8647 = vmatprep.subr.bf16.mxu1 %v8646_v49  ;;  %v530_v48 = vld [vmem:[%s9399_s27 + $0x7a8] sm:$0x3]  ;;  %v935_v49 = vrot.slane %v921_v41, %v9427_v25  ;;  %v352_v41 = vld [vmem:[%s9399_s27 + $0x218] sm:$0xff] }
  0xa6   : > { %v8674_v56 = vpack.c.bf16 %v530_v48, %v338_v47 }
  0xa7   : > { %v937_v57 = vcombine.high %v935_v49, %v935_v49 }
  0xa9   : > { %2910 = vmatmul.mubr.f32.vlgmr.msra.gmra.mrb[16].mxu0 %v860_v37  ;;  %v919_v37 = vcombine.high %v911_v28, %v911_v28 }
  0xaa   : > { %2980 = vmatmul.mubr.f32.vlgmr.msra.gmra.mrb[16].mxu1 %v867_v40  ;;  %8645 = vmatpush1.bf16.xpose.msra.mxu0 %v8644_v62  ;;  %v8670_v40 = vpack.c.bf16 %v528_v33, %v336_v32  ;;  %v339_v62 = vld [vmem:[%s9399_s27 + $0x1b0] sm:$0xff]  ;;  %v972_v32 = vcombine.high %v252_v24, %v252_v24  ;;  %v345_v33 = vld [vmem:[%s9399_s27 + $0x1e0] sm:$0xff] }
  0xab   : > { %8649 = vmatpush1.bf16.xpose.msra.mxu1 %v8648_v63  ;;  %3049 = vmatprep.mubr.f32.mxu0 %v885_v0  ;;  %v531_v63 = vld [vmem:[%s9399_s27 + $0x7b0] sm:$0x3]  ;;  %v945_v0 = vrot.slane %v250_v52, %v9427_v25  ;;  %v8692_v44 = vpack.c.bf16 %v537_v34, %v345_v33  ;;  %v541_v52 = vld [vmem:[%s9399_s27 + $0x800] sm:$0x3]  ;;  %v556_v33 = vld [vmem:[%s9399_s27 + $0x878] sm:$0x3] }
  0xac   : > { %8651 = vmatprep.subr.bf16.mxu0 %v8650_v1  ;;  %3119 = vmatprep.mubr.f32.mxu1 %v886_v2  ;;  %v342_v1 = vld [vmem:[%s9399_s27 + $0x1c8] sm:$0xff]  ;;  %v8680_v8 = vpack.c.bf16 %v531_v63, %v339_v62  ;;  %v256_v34 = vld [vmem:[%s9393_s6 + $0x98] sm:$0xff] }
  0xad   : > { %8655 = vmatprep.subr.bf16.mxu1 %v8654_v3  ;;  %v534_v2 = vld [vmem:[%s9399_s27 + $0x7c8] sm:$0x3]  ;;  %v952_v3 = vrot.slane %v938_v59, %v9427_v25  ;;  %v356_v59 = vld [vmem:[%s9399_s27 + $0x238] sm:$0xff] }
  0xae   : > { %v8682_v10 = vpack.c.bf16 %v534_v2, %v342_v1 }
  0xaf   : > { %v954_v11 = vcombine.high %v952_v3, %v952_v3 }
  0xb1   : > { %3050 = vmatmul.mubr.f32.vlgmr.msra.gmra.mrb[18].mxu0 %v877_v55  ;;  %v936_v55 = vcombine.high %v928_v46, %v928_v46 }
  0xb2   : > { %3120 = vmatmul.mubr.f32.vlgmr.msra.gmra.mrb[18].mxu1 %v884_v58  ;;  %8653 = vmatpush1.bf16.xpose.msra.mxu0 %v8652_v16  ;;  %v8678_v58 = vpack.c.bf16 %v532_v51, %v340_v50  ;;  %v343_v16 = vld [vmem:[%s9399_s27 + $0x1d0] sm:$0xff]  ;;  %v989_v50 = vcombine.high %v253_v43, %v253_v43  ;;  %v349_v51 = vld [vmem:[%s9399_s27 + $0x200] sm:$0xff] }
  0xb3   : > { %8657 = vmatpush1.bf16.xpose.msra.mxu1 %v8656_v17  ;;  %3189 = vmatprep.mubr.f32.mxu0 %v902_v18  ;;  %v535_v17 = vld [vmem:[%s9399_s27 + $0x7d0] sm:$0x3]  ;;  %v962_v18 = vrot.slane %v251_v6, %v9427_v25  ;;  %v8700_v62 = vpack.c.bf16 %v541_v52, %v349_v51  ;;  %v545_v6 = vld [vmem:[%s9399_s27 + $0x820] sm:$0x3]  ;;  %v560_v51 = vld [vmem:[%s9399_s27 + $0x898] sm:$0x3] }
  0xb4   : > { %8659 = vmatprep.subr.bf16.mxu0 %v8658_v19  ;;  %3259 = vmatprep.mubr.f32.mxu1 %v903_v20  ;;  %v346_v19 = vld [vmem:[%s9399_s27 + $0x1e8] sm:$0xff]  ;;  %v8688_v27 = vpack.c.bf16 %v535_v17, %v343_v16  ;;  %v257_v52 = vld [vmem:[%s9393_s6 + $0xa0] sm:$0xff] }
  0xb5   : > { %8663 = vmatprep.subr.bf16.mxu1 %v8662_v21  ;;  %v538_v20 = vld [vmem:[%s9399_s27 + $0x7e8] sm:$0x3]  ;;  %v969_v21 = vrot.slane %v955_v13, %v9427_v25  ;;  %v360_v13 = vld [vmem:[%s9399_s27 + $0x258] sm:$0xff] }
  0xb6   : > { %v8690_v29 = vpack.c.bf16 %v538_v20, %v346_v19 }
  0xb7   : > { %v971_v30 = vcombine.high %v969_v21, %v969_v21 }
  0xb9   : > { %3190 = vmatmul.mubr.f32.vlgmr.msra.gmra.mrb[20].mxu0 %v894_v9  ;;  %v953_v9 = vcombine.high %v945_v0, %v945_v0 }
  0xba   : > { %3260 = vmatmul.mubr.f32.vlgmr.msra.gmra.mrb[20].mxu1 %v901_v12  ;;  %8661 = vmatpush1.bf16.xpose.msra.mxu0 %v8660_v35  ;;  %v8686_v12 = vpack.c.bf16 %v536_v5, %v344_v4  ;;  %v347_v35 = vld [vmem:[%s9399_s27 + $0x1f0] sm:$0xff]  ;;  %v1006_v4 = vcombine.high %v254_v61, %v254_v61  ;;  %v353_v5 = vld [vmem:[%s9399_s27 + $0x220] sm:$0xff] }
  0xbb   : > { %8665 = vmatpush1.bf16.xpose.msra.mxu1 %v8664_v36  ;;  %3329 = vmatprep.mubr.f32.mxu0 %v919_v37  ;;  %v539_v36 = vld [vmem:[%s9399_s27 + $0x7f0] sm:$0x3]  ;;  %v979_v37 = vrot.slane %v252_v24, %v9427_v25  ;;  %v8708_v16 = vpack.c.bf16 %v545_v6, %v353_v5  ;;  %v549_v24 = vld [vmem:[%s9399_s27 + $0x840] sm:$0x3]  ;;  %v564_v5 = vld [vmem:[%s9399_s27 + $0x8b8] sm:$0x3] }
  0xbc   : > { %8667 = vmatprep.subr.bf16.mxu0 %v8666_v38  ;;  %3399 = vmatprep.mubr.f32.mxu1 %v920_v39  ;;  %v350_v38 = vld [vmem:[%s9399_s27 + $0x208] sm:$0xff]  ;;  %v8696_v45 = vpack.c.bf16 %v539_v36, %v347_v35 }
  0xbd   : > { %8671 = vmatprep.subr.bf16.mxu1 %v8670_v40  ;;  %v542_v39 = vld [vmem:[%s9399_s27 + $0x808] sm:$0x3]  ;;  %v986_v40 = vrot.slane %v972_v32, %v9427_v25  ;;  %v364_v32 = vld [vmem:[%s9399_s27 + $0x278] sm:$0xff] }
  0xbe   : > { %v8698_v47 = vpack.c.bf16 %v542_v39, %v350_v38  ;;  %v258_v6 = vld [vmem:[%s9393_s6 + $0xa8] sm:$0xff] }
  0xbf   : > { %v988_v48 = vcombine.high %v986_v40, %v986_v40 }
  0xc1   : > { %3330 = vmatmul.mubr.f32.vlgmr.msra.gmra.mrb[22].mxu0 %v911_v28  ;;  %v970_v28 = vcombine.high %v962_v18, %v962_v18 }
  0xc2   : > { %3400 = vmatmul.mubr.f32.vlgmr.msra.gmra.mrb[22].mxu1 %v918_v31  ;;  %8669 = vmatpush1.bf16.xpose.msra.mxu0 %v8668_v53  ;;  %v8694_v31 = vpack.c.bf16 %v540_v23, %v348_v22  ;;  %v351_v53 = vld [vmem:[%s9399_s27 + $0x210] sm:$0xff]  ;;  %v1023_v22 = vcombine.high %v255_v15, %v255_v15  ;;  %v357_v23 = vld [vmem:[%s9399_s27 + $0x240] sm:$0xff] }
  0xc3   : > { %8673 = vmatpush1.bf16.xpose.msra.mxu1 %v8672_v54  ;;  %3469 = vmatprep.mubr.f32.mxu0 %v936_v55  ;;  %v543_v54 = vld [vmem:[%s9399_s27 + $0x810] sm:$0x3]  ;;  %v996_v55 = vrot.slane %v253_v43, %v9427_v25  ;;  %v8716_v35 = vpack.c.bf16 %v549_v24, %v357_v23  ;;  %v553_v43 = vld [vmem:[%s9399_s27 + $0x860] sm:$0x3]  ;;  %v568_v23 = vld [vmem:[%s9399_s27 + $0x8d8] sm:$0x3] }
  0xc4   : > { %8675 = vmatprep.subr.bf16.mxu0 %v8674_v56  ;;  %3539 = vmatprep.mubr.f32.mxu1 %v937_v57  ;;  %v354_v56 = vld [vmem:[%s9399_s27 + $0x228] sm:$0xff]  ;;  %v8704_v63 = vpack.c.bf16 %v543_v54, %v351_v53  ;;  %v259_v24 = vld [vmem:[%s9393_s6 + $0xb0] sm:$0xff] }
  0xc5   : > { %8679 = vmatprep.subr.bf16.mxu1 %v8678_v58  ;;  %v546_v57 = vld [vmem:[%s9399_s27 + $0x828] sm:$0x3]  ;;  %v1003_v58 = vrot.slane %v989_v50, %v9427_v25  ;;  %v368_v50 = vld [vmem:[%s9399_s27 + $0x298] sm:$0xff] }
  0xc6   : > { %v8706_v1 = vpack.c.bf16 %v546_v57, %v354_v56 }
  0xc7   : > { %v1005_v2 = vcombine.high %v1003_v58, %v1003_v58 }
  0xc9   : > { %3470 = vmatmul.mubr.f32.vlgmr.msra.gmra.mrb[24].mxu0 %v928_v46  ;;  %v987_v46 = vcombine.high %v979_v37, %v979_v37 }
  0xca   : > { %3540 = vmatmul.mubr.f32.vlgmr.msra.gmra.mrb[24].mxu1 %v935_v49  ;;  %8677 = vmatpush1.bf16.xpose.msra.mxu0 %v8676_v7  ;;  %v8702_v49 = vpack.c.bf16 %v544_v42, %v352_v41  ;;  %v355_v7 = vld [vmem:[%s9399_s27 + $0x230] sm:$0xff]  ;;  %v1040_v41 = vcombine.high %v256_v34, %v256_v34  ;;  %v361_v42 = vld [vmem:[%s9399_s27 + $0x260] sm:$0xff] }
  0xcb   : > { %8681 = vmatpush1.bf16.xpose.msra.mxu1 %v8680_v8  ;;  %3609 = vmatprep.mubr.f32.mxu0 %v953_v9  ;;  %v547_v8 = vld [vmem:[%s9399_s27 + $0x830] sm:$0x3]  ;;  %v1013_v9 = vrot.slane %v254_v61, %v9427_v25  ;;  %v8724_v53 = vpack.c.bf16 %v553_v43, %v361_v42  ;;  %v557_v61 = vld [vmem:[%s9399_s27 + $0x880] sm:$0x3]  ;;  %v572_v42 = vld [vmem:[%s9399_s27 + $0x8f8] sm:$0x3] }
  0xcc   : > { %8683 = vmatprep.subr.bf16.mxu0 %v8682_v10  ;;  %3679 = vmatprep.mubr.f32.mxu1 %v954_v11  ;;  %v358_v10 = vld [vmem:[%s9399_s27 + $0x248] sm:$0xff]  ;;  %v8712_v17 = vpack.c.bf16 %v547_v8, %v355_v7  ;;  %v260_v43 = vld [vmem:[%s9393_s6 + $0xb8] sm:$0xff] }
  0xcd   : > { %8687 = vmatprep.subr.bf16.mxu1 %v8686_v12  ;;  %v550_v11 = vld [vmem:[%s9399_s27 + $0x848] sm:$0x3]  ;;  %v1020_v12 = vrot.slane %v1006_v4, %v9427_v25  ;;  %v372_v4 = vld [vmem:[%s9399_s27 + $0x2b8] sm:$0xff] }
  0xce   : > { %v8714_v19 = vpack.c.bf16 %v550_v11, %v358_v10 }
  0xcf   : > { %v1022_v20 = vcombine.high %v1020_v12, %v1020_v12 }
  0xd1   : > { %3610 = vmatmul.mubr.f32.vlgmr.msra.gmra.mrb[26].mxu0 %v945_v0  ;;  %v1004_v0 = vcombine.high %v996_v55, %v996_v55 }
  0xd2   : > { %3680 = vmatmul.mubr.f32.vlgmr.msra.gmra.mrb[26].mxu1 %v952_v3  ;;  %8685 = vmatpush1.bf16.xpose.msra.mxu0 %v8684_v26  ;;  %v8710_v3 = vpack.c.bf16 %v548_v60, %v356_v59  ;;  %v359_v26 = vld [vmem:[%s9399_s27 + $0x250] sm:$0xff]  ;;  %v1057_v59 = vcombine.high %v257_v52, %v257_v52  ;;  %v365_v60 = vld [vmem:[%s9399_s27 + $0x280] sm:$0xff] }
  0xd3   : > { %8689 = vmatpush1.bf16.xpose.msra.mxu1 %v8688_v27  ;;  %3749 = vmatprep.mubr.f32.mxu0 %v970_v28  ;;  %v551_v27 = vld [vmem:[%s9399_s27 + $0x850] sm:$0x3]  ;;  %v1030_v28 = vrot.slane %v255_v15, %v9427_v25  ;;  %v8732_v7 = vpack.c.bf16 %v557_v61, %v365_v60  ;;  %v561_v15 = vld [vmem:[%s9399_s27 + $0x8a0] sm:$0x3]  ;;  %v576_v60 = vld [vmem:[%s9399_s27 + $0x918] sm:$0x3] }
  0xd4   : > { %8691 = vmatprep.subr.bf16.mxu0 %v8690_v29  ;;  %3819 = vmatprep.mubr.f32.mxu1 %v971_v30  ;;  %v362_v29 = vld [vmem:[%s9399_s27 + $0x268] sm:$0xff]  ;;  %v8720_v36 = vpack.c.bf16 %v551_v27, %v359_v26  ;;  %v261_v61 = vld [vmem:[%s9393_s6 + $0xc0] sm:$0xff] }
  0xd5   : > { %8695 = vmatprep.subr.bf16.mxu1 %v8694_v31  ;;  %v554_v30 = vld [vmem:[%s9399_s27 + $0x868] sm:$0x3]  ;;  %v1037_v31 = vrot.slane %v1023_v22, %v9427_v25  ;;  %v376_v22 = vld [vmem:[%s9399_s27 + $0x2d8] sm:$0xff] }
  0xd6   : > { %v8722_v38 = vpack.c.bf16 %v554_v30, %v362_v29 }
  0xd7   : > { %v1039_v39 = vcombine.high %v1037_v31, %v1037_v31 }
  0xd9   : > { %3750 = vmatmul.mubr.f32.vlgmr.msra.gmra.mrb[28].mxu0 %v962_v18  ;;  %v1021_v18 = vcombine.high %v1013_v9, %v1013_v9 }
  0xda   : > { %3820 = vmatmul.mubr.f32.vlgmr.msra.gmra.mrb[28].mxu1 %v969_v21  ;;  %8693 = vmatpush1.bf16.xpose.msra.mxu0 %v8692_v44  ;;  %v8718_v21 = vpack.c.bf16 %v552_v14, %v360_v13  ;;  %v363_v44 = vld [vmem:[%s9399_s27 + $0x270] sm:$0xff]  ;;  %v1074_v13 = vcombine.high %v258_v6, %v258_v6  ;;  %v369_v14 = vld [vmem:[%s9399_s27 + $0x2a0] sm:$0xff] }
  0xdb   : > { %8697 = vmatpush1.bf16.xpose.msra.mxu1 %v8696_v45  ;;  %3889 = vmatprep.mubr.f32.mxu0 %v987_v46  ;;  %v555_v45 = vld [vmem:[%s9399_s27 + $0x870] sm:$0x3]  ;;  %v1047_v46 = vrot.slane %v256_v34, %v9427_v25  ;;  %v8740_v26 = vpack.c.bf16 %v561_v15, %v369_v14  ;;  %v565_v34 = vld [vmem:[%s9399_s27 + $0x8c0] sm:$0x3]  ;;  %v580_v14 = vld [vmem:[%s9399_s27 + $0x938] sm:$0x3] }
  0xdc   : > { %8699 = vmatprep.subr.bf16.mxu0 %v8698_v47  ;;  %3959 = vmatprep.mubr.f32.mxu1 %v988_v48  ;;  %v366_v47 = vld [vmem:[%s9399_s27 + $0x288] sm:$0xff]  ;;  %v8728_v54 = vpack.c.bf16 %v555_v45, %v363_v44 }
  0xdd   : > { %8703 = vmatprep.subr.bf16.mxu1 %v8702_v49  ;;  %v558_v48 = vld [vmem:[%s9399_s27 + $0x888] sm:$0x3]  ;;  %v1054_v49 = vrot.slane %v1040_v41, %v9427_v25  ;;  %v380_v41 = vld [vmem:[%s9399_s27 + $0x2f8] sm:$0xff] }
  0xde   : > { %v8730_v56 = vpack.c.bf16 %v558_v48, %v366_v47  ;;  %v262_v15 = vld [vmem:[%s9393_s6 + $0xc8] sm:$0xff] }
  0xdf   : > { %v1056_v57 = vcombine.high %v1054_v49, %v1054_v49 }
  0xe1   : > { %3890 = vmatmul.mubr.f32.vlgmr.msra.gmra.mrb[30].mxu0 %v979_v37  ;;  %v1038_v37 = vcombine.high %v1030_v28, %v1030_v28 }
  0xe2   : > { %3960 = vmatmul.mubr.f32.vlgmr.msra.gmra.mrb[30].mxu1 %v986_v40  ;;  %8701 = vmatpush1.bf16.xpose.msra.mxu0 %v8700_v62  ;;  %v8726_v40 = vpack.c.bf16 %v556_v33, %v364_v32  ;;  %v367_v62 = vld [vmem:[%s9399_s27 + $0x290] sm:$0xff]  ;;  %v1091_v32 = vcombine.high %v259_v24, %v259_v24  ;;  %v373_v33 = vld [vmem:[%s9399_s27 + $0x2c0] sm:$0xff] }
  0xe3   : > { %8705 = vmatpush1.bf16.xpose.msra.mxu1 %v8704_v63  ;;  %4029 = vmatprep.mubr.f32.mxu0 %v1004_v0  ;;  %v559_v63 = vld [vmem:[%s9399_s27 + $0x890] sm:$0x3]  ;;  %v1064_v0 = vrot.slane %v257_v52, %v9427_v25  ;;  %v8748_v44 = vpack.c.bf16 %v565_v34, %v373_v33  ;;  %v569_v52 = vld [vmem:[%s9399_s27 + $0x8e0] sm:$0x3]  ;;  %v584_v33 = vld [vmem:[%s9399_s27 + $0x958] sm:$0x3] }
  0xe4   : > { %8707 = vmatprep.subr.bf16.mxu0 %v8706_v1  ;;  %4099 = vmatprep.mubr.f32.mxu1 %v1005_v2  ;;  %v370_v1 = vld [vmem:[%s9399_s27 + $0x2a8] sm:$0xff]  ;;  %v8736_v8 = vpack.c.bf16 %v559_v63, %v367_v62  ;;  %v263_v34 = vld [vmem:[%s9393_s6 + $0xd0] sm:$0xff] }
  0xe5   : > { %8711 = vmatprep.subr.bf16.mxu1 %v8710_v3  ;;  %v562_v2 = vld [vmem:[%s9399_s27 + $0x8a8] sm:$0x3]  ;;  %v1071_v3 = vrot.slane %v1057_v59, %v9427_v25  ;;  %v384_v59 = vld [vmem:[%s9399_s27 + $0x318] sm:$0xff] }
  0xe6   : > { %v8738_v10 = vpack.c.bf16 %v562_v2, %v370_v1 }
  0xe7   : > { %v1073_v11 = vcombine.high %v1071_v3, %v1071_v3 }
  0xe9   : > { %4030 = vmatmul.mubr.f32.vlgmr.msra.gmra.mrb[32].mxu0 %v996_v55  ;;  %v1055_v55 = vcombine.high %v1047_v46, %v1047_v46 }
  0xea   : > { %4100 = vmatmul.mubr.f32.vlgmr.msra.gmra.mrb[32].mxu1 %v1003_v58  ;;  %8709 = vmatpush1.bf16.xpose.msra.mxu0 %v8708_v16  ;;  %v8734_v58 = vpack.c.bf16 %v560_v51, %v368_v50  ;;  %v371_v16 = vld [vmem:[%s9399_s27 + $0x2b0] sm:$0xff]  ;;  %v1108_v50 = vcombine.high %v260_v43, %v260_v43  ;;  %v377_v51 = vld [vmem:[%s9399_s27 + $0x2e0] sm:$0xff] }
  0xeb   : > { %8713 = vmatpush1.bf16.xpose.msra.mxu1 %v8712_v17  ;;  %4169 = vmatprep.mubr.f32.mxu0 %v1021_v18  ;;  %v563_v17 = vld [vmem:[%s9399_s27 + $0x8b0] sm:$0x3]  ;;  %v1081_v18 = vrot.slane %v258_v6, %v9427_v25  ;;  %v8756_v62 = vpack.c.bf16 %v569_v52, %v377_v51  ;;  %v573_v6 = vld [vmem:[%s9399_s27 + $0x900] sm:$0x3]  ;;  %v588_v51 = vld [vmem:[%s9399_s27 + $0x978] sm:$0x3] }
  0xec   : > { %8715 = vmatprep.subr.bf16.mxu0 %v8714_v19  ;;  %4239 = vmatprep.mubr.f32.mxu1 %v1022_v20  ;;  %v374_v19 = vld [vmem:[%s9399_s27 + $0x2c8] sm:$0xff]  ;;  %v8744_v27 = vpack.c.bf16 %v563_v17, %v371_v16  ;;  %v264_v52 = vld [vmem:[%s9393_s6 + $0xd8] sm:$0xff] }
  0xed   : > { %8719 = vmatprep.subr.bf16.mxu1 %v8718_v21  ;;  %v566_v20 = vld [vmem:[%s9399_s27 + $0x8c8] sm:$0x3]  ;;  %v1088_v21 = vrot.slane %v1074_v13, %v9427_v25  ;;  %v388_v13 = vld [vmem:[%s9399_s27 + $0x338] sm:$0xff] }
  0xee   : > { %v8746_v29 = vpack.c.bf16 %v566_v20, %v374_v19 }
  0xef   : > { %v1090_v30 = vcombine.high %v1088_v21, %v1088_v21 }
  0xf1   : > { %4170 = vmatmul.mubr.f32.vlgmr.msra.gmra.mrb[34].mxu0 %v1013_v9  ;;  %v1072_v9 = vcombine.high %v1064_v0, %v1064_v0 }
  0xf2   : > { %4240 = vmatmul.mubr.f32.vlgmr.msra.gmra.mrb[34].mxu1 %v1020_v12  ;;  %8717 = vmatpush1.bf16.xpose.msra.mxu0 %v8716_v35  ;;  %v8742_v12 = vpack.c.bf16 %v564_v5, %v372_v4  ;;  %v375_v35 = vld [vmem:[%s9399_s27 + $0x2d0] sm:$0xff]  ;;  %v1125_v4 = vcombine.high %v261_v61, %v261_v61  ;;  %v381_v5 = vld [vmem:[%s9399_s27 + $0x300] sm:$0xff] }
  0xf3   : > { %8721 = vmatpush1.bf16.xpose.msra.mxu1 %v8720_v36  ;;  %4309 = vmatprep.mubr.f32.mxu0 %v1038_v37  ;;  %v567_v36 = vld [vmem:[%s9399_s27 + $0x8d0] sm:$0x3]  ;;  %v1098_v37 = vrot.slane %v259_v24, %v9427_v25  ;;  %v8764_v16 = vpack.c.bf16 %v573_v6, %v381_v5  ;;  %v577_v24 = vld [vmem:[%s9399_s27 + $0x920] sm:$0x3]  ;;  %v592_v5 = vld [vmem:[%s9399_s27 + $0x998] sm:$0x3] }
  0xf4   : > { %8723 = vmatprep.subr.bf16.mxu0 %v8722_v38  ;;  %4379 = vmatprep.mubr.f32.mxu1 %v1039_v39  ;;  %v378_v38 = vld [vmem:[%s9399_s27 + $0x2e8] sm:$0xff]  ;;  %v8752_v45 = vpack.c.bf16 %v567_v36, %v375_v35  ;;  %v265_v6 = vld [vmem:[%s9393_s6 + $0xe0] sm:$0xff] }
  0xf5   : > { %8727 = vmatprep.subr.bf16.mxu1 %v8726_v40  ;;  %v570_v39 = vld [vmem:[%s9399_s27 + $0x8e8] sm:$0x3]  ;;  %v1105_v40 = vrot.slane %v1091_v32, %v9427_v25  ;;  %v392_v32 = vld [vmem:[%s9399_s27 + $0x358] sm:$0xff] }
  0xf6   : > { %v8754_v47 = vpack.c.bf16 %v570_v39, %v378_v38 }
  0xf7   : > { %v1107_v48 = vcombine.high %v1105_v40, %v1105_v40 }
  0xf9   : > { %4310 = vmatmul.mubr.f32.vlgmr.msra.gmra.mrb[36].mxu0 %v1030_v28  ;;  %v1089_v28 = vcombine.high %v1081_v18, %v1081_v18 }
  0xfa   : > { %4380 = vmatmul.mubr.f32.vlgmr.msra.gmra.mrb[36].mxu1 %v1037_v31  ;;  %8725 = vmatpush1.bf16.xpose.msra.mxu0 %v8724_v53  ;;  %v8750_v31 = vpack.c.bf16 %v568_v23, %v376_v22  ;;  %v379_v53 = vld [vmem:[%s9399_s27 + $0x2f0] sm:$0xff]  ;;  %v1142_v22 = vcombine.high %v262_v15, %v262_v15  ;;  %v385_v23 = vld [vmem:[%s9399_s27 + $0x320] sm:$0xff] }
  0xfb   : > { %8729 = vmatpush1.bf16.xpose.msra.mxu1 %v8728_v54  ;;  %4449 = vmatprep.mubr.f32.mxu0 %v1055_v55  ;;  %v571_v54 = vld [vmem:[%s9399_s27 + $0x8f0] sm:$0x3]  ;;  %v1115_v55 = vrot.slane %v260_v43, %v9427_v25  ;;  %v8772_v35 = vpack.c.bf16 %v577_v24, %v385_v23  ;;  %v581_v43 = vld [vmem:[%s9399_s27 + $0x940] sm:$0x3] }
  0xfc   : > { %8731 = vmatprep.subr.bf16.mxu0 %v8730_v56  ;;  %4519 = vmatprep.mubr.f32.mxu1 %v1056_v57  ;;  %v382_v56 = vld [vmem:[%s9399_s27 + $0x308] sm:$0xff]  ;;  %v8760_v63 = vpack.c.bf16 %v571_v54, %v379_v53 }
  0xfd   : > { %8735 = vmatprep.subr.bf16.mxu1 %v8734_v58  ;;  %v574_v57 = vld [vmem:[%s9399_s27 + $0x908] sm:$0x3]  ;;  %v1122_v58 = vrot.slane %v1108_v50, %v9427_v25  ;;  %v396_v50 = vld [vmem:[%s9399_s27 + $0x378] sm:$0xff] }
  0xfe   : > { %v8762_v1 = vpack.c.bf16 %v574_v57, %v382_v56 }
  0xff   : > { %v1124_v2 = vcombine.high %v1122_v58, %v1122_v58 }
 0x101   : > { %4450 = vmatmul.mubr.f32.vlgmr.msra.gmra.mrb[38].mxu0 %v1047_v46  ;;  %v1106_v46 = vcombine.high %v1098_v37, %v1098_v37 }
 0x102   : > { %4520 = vmatmul.mubr.f32.vlgmr.msra.gmra.mrb[38].mxu1 %v1054_v49  ;;  %8733 = vmatpush1.bf16.xpose.msra.mxu0 %v8732_v7  ;;  %v8758_v49 = vpack.c.bf16 %v572_v42, %v380_v41  ;;  %v383_v7 = vld [vmem:[%s9399_s27 + $0x310] sm:$0xff]  ;;  %v1159_v41 = vcombine.high %v263_v34, %v263_v34  ;;  %v389_v42 = vld [vmem:[%s9399_s27 + $0x340] sm:$0xff] }
 0x103   : > { %8737 = vmatpush1.bf16.xpose.msra.mxu1 %v8736_v8  ;;  %4589 = vmatprep.mubr.f32.mxu0 %v1072_v9  ;;  %v575_v8 = vld [vmem:[%s9399_s27 + $0x910] sm:$0x3]  ;;  %v1132_v9 = vrot.slane %v261_v61, %v9427_v25  ;;  %v8780_v53 = vpack.c.bf16 %v581_v43, %v389_v42  ;;  %v585_v61 = vld [vmem:[%s9399_s27 + $0x960] sm:$0x3] }
 0x104   : > { %8739 = vmatprep.subr.bf16.mxu0 %v8738_v10  ;;  %4659 = vmatprep.mubr.f32.mxu1 %v1073_v11  ;;  %v386_v10 = vld [vmem:[%s9399_s27 + $0x328] sm:$0xff]  ;;  %v8768_v17 = vpack.c.bf16 %v575_v8, %v383_v7 }
 0x105   : > { %8743 = vmatprep.subr.bf16.mxu1 %v8742_v12  ;;  %v578_v11 = vld [vmem:[%s9399_s27 + $0x928] sm:$0x3]  ;;  %v1139_v12 = vrot.slane %v1125_v4, %v9427_v25  ;;  %v400_v4 = vld [vmem:[%s9399_s27 + $0x398] sm:$0xff] }
 0x106   : > { %v8770_v19 = vpack.c.bf16 %v578_v11, %v386_v10 }
 0x107   : > { %v1141_v20 = vcombine.high %v1139_v12, %v1139_v12 }
 0x109   : > { %4590 = vmatmul.mubr.f32.vlgmr.msra.gmra.mrb[40].mxu0 %v1064_v0  ;;  %v1123_v0 = vcombine.high %v1115_v55, %v1115_v55 }
 0x10a   : > { %4660 = vmatmul.mubr.f32.vlgmr.msra.gmra.mrb[40].mxu1 %v1071_v3  ;;  %8741 = vmatpush1.bf16.xpose.msra.mxu0 %v8740_v26  ;;  %v8766_v3 = vpack.c.bf16 %v576_v60, %v384_v59  ;;  %v387_v26 = vld [vmem:[%s9399_s27 + $0x330] sm:$0xff]  ;;  %v1176_v59 = vcombine.high %v264_v52, %v264_v52  ;;  %v393_v60 = vld [vmem:[%s9399_s27 + $0x360] sm:$0xff] }
 0x10b   : > { %8745 = vmatpush1.bf16.xpose.msra.mxu1 %v8744_v27  ;;  %4729 = vmatprep.mubr.f32.mxu0 %v1089_v28  ;;  %v579_v27 = vld [vmem:[%s9399_s27 + $0x930] sm:$0x3]  ;;  %v1149_v28 = vrot.slane %v262_v15, %v9427_v25  ;;  %v8788_v7 = vpack.c.bf16 %v585_v61, %v393_v60  ;;  %v589_v15 = vld [vmem:[%s9399_s27 + $0x980] sm:$0x3] }
 0x10c   : > { %8747 = vmatprep.subr.bf16.mxu0 %v8746_v29  ;;  %4799 = vmatprep.mubr.f32.mxu1 %v1090_v30  ;;  %v390_v29 = vld [vmem:[%s9399_s27 + $0x348] sm:$0xff]  ;;  %v8776_v36 = vpack.c.bf16 %v579_v27, %v387_v26 }
 0x10d   : > { %8751 = vmatprep.subr.bf16.mxu1 %v8750_v31  ;;  %v582_v30 = vld [vmem:[%s9399_s27 + $0x948] sm:$0x3]  ;;  %v1156_v31 = vrot.slane %v1142_v22, %v9427_v25 }
 0x10e   : > { %v8778_v38 = vpack.c.bf16 %v582_v30, %v390_v29  ;;  %v594_v22 = vld [vmem:[%s9399_s27 + $0x9a8] sm:$0x3]  ;;  %v596_v29 = vld [vmem:[%s9399_s27 + $0x9b8] sm:$0x3] }
 0x10f   : > { %v1158_v39 = vcombine.high %v1156_v31, %v1156_v31  ;;  %v266_v30 = vld [vmem:[%s9393_s6 + $0xe8] sm:$0xff] }
 0x110   : > { %v1217_v42 = vrot.slane %v266_v30, %v9427_v25 }
 0x111   : > { %4730 = vmatmul.mubr.f32.vlgmr.msra.gmra.mrb[42].mxu0 %v1081_v18  ;;  %v1140_v18 = vcombine.high %v1132_v9, %v1132_v9 }
 0x112   : > { %4800 = vmatmul.mubr.f32.vlgmr.msra.gmra.mrb[42].mxu1 %v1088_v21  ;;  %8749 = vmatpush1.bf16.xpose.msra.mxu0 %v8748_v44  ;;  %v8774_v21 = vpack.c.bf16 %v580_v14, %v388_v13  ;;  %v391_v44 = vld [vmem:[%s9399_s27 + $0x350] sm:$0xff]  ;;  %v1193_v13 = vcombine.high %v265_v6, %v265_v6  ;;  %v397_v14 = vld [vmem:[%s9399_s27 + $0x380] sm:$0xff] }
 0x113   : > { %8753 = vmatpush1.bf16.xpose.msra.mxu1 %v8752_v45  ;;  %4869 = vmatprep.mubr.f32.mxu0 %v1106_v46  ;;  %v583_v45 = vld [vmem:[%s9399_s27 + $0x950] sm:$0x3]  ;;  %v1166_v46 = vrot.slane %v263_v34, %v9427_v25 }
 0x114   : > { %8755 = vmatprep.subr.bf16.mxu0 %v8754_v47  ;;  %4939 = vmatprep.mubr.f32.mxu1 %v1107_v48  ;;  %v394_v47 = vld [vmem:[%s9399_s27 + $0x368] sm:$0xff]  ;;  %v8784_v54 = vpack.c.bf16 %v583_v45, %v391_v44  ;;  %v1207_v23 = vrot.slane %v1193_v13, %v9427_v25  ;;  %v268_v13 = vld [vmem:[%s9393_s6 + $0xf8] sm:$0xff] }
 0x115   : > { %8759 = vmatprep.subr.bf16.mxu1 %v8758_v49  ;;  %v586_v48 = vld [vmem:[%s9399_s27 + $0x968] sm:$0x3]  ;;  %v1173_v49 = vrot.slane %v1159_v41, %v9427_v25  ;;  %v595_v41 = vld [vmem:[%s9399_s27 + $0x9b0] sm:$0x3] }
 0x116   : > { %v8786_v56 = vpack.c.bf16 %v586_v48, %v394_v47  ;;  %v406_v45 = vld [vmem:[%s9399_s27 + $0x3c8] sm:$0xff] }
 0x117   : > { %v1175_v57 = vcombine.high %v1173_v49, %v1173_v49 }
 0x119   : > { %4870 = vmatmul.mubr.f32.vlgmr.msra.gmra.mrb[44].mxu0 %v1098_v37  ;;  %v1157_v37 = vcombine.high %v1149_v28, %v1149_v28 }
 0x11a   : > { %4940 = vmatmul.mubr.f32.vlgmr.msra.gmra.mrb[44].mxu1 %v1105_v40  ;;  %8757 = vmatpush1.bf16.xpose.msra.mxu0 %v8756_v62  ;;  %v8782_v40 = vpack.c.bf16 %v584_v33, %v392_v32  ;;  %v395_v62 = vld [vmem:[%s9399_s27 + $0x370] sm:$0xff] }
 0x11b   : > { %8761 = vmatpush1.bf16.xpose.msra.mxu1 %v8760_v63  ;;  %5009 = vmatprep.mubr.f32.mxu0 %v1123_v0  ;;  %v587_v63 = vld [vmem:[%s9399_s27 + $0x970] sm:$0x3]  ;;  %v1183_v0 = vrot.slane %v264_v52, %v9427_v25  ;;  %v600_v52 = vld [vmem:[%s9399_s27 + $0x9d8] sm:$0x3] }
 0x11c   : > { %8763 = vmatprep.subr.bf16.mxu0 %v8762_v1  ;;  %5079 = vmatprep.mubr.f32.mxu1 %v1124_v2  ;;  %v398_v1 = vld [vmem:[%s9399_s27 + $0x388] sm:$0xff]  ;;  %v8792_v8 = vpack.c.bf16 %v587_v63, %v395_v62  ;;  %v405_v62 = vld [vmem:[%s9399_s27 + $0x3c0] sm:$0xff] }
 0x11d   : > { %8767 = vmatprep.subr.bf16.mxu1 %v8766_v3  ;;  %v590_v2 = vld [vmem:[%s9399_s27 + $0x988] sm:$0x3]  ;;  %v1190_v3 = vrot.slane %v1176_v59, %v9427_v25  ;;  %v597_v63 = vld [vmem:[%s9399_s27 + $0x9c0] sm:$0x3] }
 0x11e   : > { %v8794_v10 = vpack.c.bf16 %v590_v2, %v398_v1  ;;  %v599_v1 = vld [vmem:[%s9399_s27 + $0x9d0] sm:$0x3] }
 0x11f   : > { %v1192_v11 = vcombine.high %v1190_v3, %v1190_v3 }
 0x121   : > { %5010 = vmatmul.mubr.f32.vlgmr.msra.gmra.mrb[46].mxu0 %v1115_v55  ;;  %v1174_v55 = vcombine.high %v1166_v46, %v1166_v46 }
 0x122   : > { %5080 = vmatmul.mubr.f32.vlgmr.msra.gmra.mrb[46].mxu1 %v1122_v58  ;;  %8765 = vmatpush1.bf16.xpose.msra.mxu0 %v8764_v16  ;;  %v8790_v58 = vpack.c.bf16 %v588_v51, %v396_v50  ;;  %v399_v16 = vld [vmem:[%s9399_s27 + $0x390] sm:$0xff]  ;;  %v408_v51 = vld [vmem:[%s9399_s27 + $0x3d8] sm:$0xff] }
 0x123   : > { %8769 = vmatpush1.bf16.xpose.msra.mxu1 %v8768_v17  ;;  %5149 = vmatprep.mubr.f32.mxu0 %v1140_v18  ;;  %v591_v17 = vld [vmem:[%s9399_s27 + $0x990] sm:$0x3]  ;;  %v1200_v18 = vrot.slane %v265_v6, %v9427_v25  ;;  %v8814_v60 = vpack.c.bf16 %v600_v52, %v408_v51  ;;  %v602_v6 = vld [vmem:[%s9399_s27 + $0x9e8] sm:$0x3] }
 0x124   : > { %8771 = vmatprep.subr.bf16.mxu0 %v8770_v19  ;;  %5219 = vmatprep.mubr.f32.mxu1 %v1141_v20  ;;  %v8800_v32 = vpack.c.bf16 %v591_v17, %v399_v16 }
 0x125   : > { %8775 = vmatprep.subr.bf16.mxu1 %v8774_v21  ;;  %v402_v21 = vld [vmem:[%s9399_s27 + $0x3a8] sm:$0xff]  ;;  %v1208_v33 = vcombine.high %v1200_v18, %v1200_v18 }
 0x126   : > { %v8802_v34 = vpack.c.bf16 %v594_v22, %v402_v21  ;;  %v1244_v21 = vcombine.high %v268_v13, %v268_v13  ;;  %v409_v22 = vld [vmem:[%s9399_s27 + $0x3e0] sm:$0xff] }
 0x129   : > { %5150 = vmatmul.mubr.f32.vlgmr.msra.gmra.mrb[48].mxu0 %v1132_v9  ;;  %v1191_v9 = vcombine.high %v1183_v0, %v1183_v0 }
 0x12a   : > { %5220 = vmatmul.mubr.f32.vlgmr.msra.gmra.mrb[48].mxu1 %v1139_v12  ;;  %8773 = vmatpush1.bf16.xpose.msra.mxu0 %v8772_v35  ;;  %v8798_v12 = vpack.c.bf16 %v592_v5, %v400_v4  ;;  %v1209_v35 = vcombine.high %v1207_v23, %v1207_v23  ;;  %v410_v5 = vld [vmem:[%s9399_s27 + $0x3e8] sm:$0xff] }
 0x12b   : > { %8777 = vmatpush1.bf16.xpose.msra.mxu1 %v8776_v36  ;;  %5289 = vmatprep.mubr.f32.mxu0 %v1157_v37  ;;  %v1210_v37 = vcombine.high %v266_v30, %v266_v30  ;;  %v414_v30 = vld [vmem:[%s9399_s27 + $0x408] sm:$0xff] }
 0x12c   : > { %8779 = vmatprep.subr.bf16.mxu0 %v8778_v38  ;;  %5359 = vmatprep.mubr.f32.mxu1 %v1158_v39  ;;  %v401_v38 = vld [vmem:[%s9399_s27 + $0x3a0] sm:$0xff] }
 0x12d   : > { %8783 = vmatprep.subr.bf16.mxu1 %v8782_v40  ;;  %v593_v39 = vld [vmem:[%s9399_s27 + $0x9a0] sm:$0x3]  ;;  %v403_v40 = vld [vmem:[%s9399_s27 + $0x3b0] sm:$0xff]  ;;  %v1224_v47 = vrot.slane %v1210_v37, %v9427_v25  ;;  %v608_v37 = vld [vmem:[%s9399_s27 + $0xa18] sm:$0x3] }
 0x12f   : > { %v1226_v59 = vcombine.high %v1224_v47, %v1224_v47 }
 0x131   : > { %5290 = vmatmul.mubr.f32.vlgmr.msra.gmra.mrb[50].mxu0 %v1149_v28  ;;  %v404_v28 = vld [vmem:[%s9399_s27 + $0x3b8] sm:$0xff] }
 0x132   : > { %5360 = vmatmul.mubr.f32.vlgmr.msra.gmra.mrb[50].mxu1 %v1156_v31  ;;  %8781 = vmatpush1.bf16.xpose.msra.mxu0 %v8780_v53  ;;  %v8796_v31 = vpack.c.bf16 %v589_v15, %v397_v14  ;;  %v8806_v36 = vpack.c.bf16 %v596_v29, %v404_v28  ;;  %v267_v53 = vld [vmem:[%s9393_s6 + $0xf0] sm:$0xff]  ;;  %v8812_v14 = vpack.c.bf16 %v597_v63, %v405_v62  ;;  %v270_v62 = vld [vmem:[%s9393_s6 + $0x108] sm:$0xff] }
 0x133   : > { %8785 = vmatpush1.bf16.xpose.msra.mxu1 %v8784_v54  ;;  %5429 = vmatprep.mubr.f32.mxu0 %v1174_v55  ;;  %v8804_v54 = vpack.c.bf16 %v593_v39, %v401_v38  ;;  %v8808_v55 = vpack.c.bf16 %v595_v41, %v403_v40  ;;  %v1227_v61 = vcombine.high %v267_v53, %v267_v53  ;;  %v269_v38 = vld [vmem:[%s9393_s6 + $0x100] sm:$0xff] }
 0x134   : > { %8787 = vmatprep.subr.bf16.mxu0 %v8786_v56  ;;  %5499 = vmatprep.mubr.f32.mxu1 %v1175_v57  ;;  %v1225_v57 = vcombine.high %v1217_v42, %v1217_v42  ;;  %v1234_v2 = vrot.slane %v267_v53, %v9427_v25  ;;  %v1268_v51 = vrot.slane %v269_v38, %v9427_v25 }
 0x135   : > { %8791 = vmatprep.subr.bf16.mxu1 %v8790_v58 }
 0x136   : > { %v1242_v17 = vcombine.high %v1234_v2, %v1234_v2 }
 0x139   : > { %5430 = vmatmul.mubr.f32.vlgmr.msra.gmra.mrb[52].mxu0 %v1166_v46  ;;  %v598_v46 = vld [vmem:[%s9399_s27 + $0x9c8] sm:$0x3] }
 0x13a   : > { %5500 = vmatmul.mubr.f32.vlgmr.msra.gmra.mrb[52].mxu1 %v1173_v49  ;;  %8789 = vmatpush1.bf16.xpose.msra.mxu0 %v8788_v7  ;;  %v8810_v58 = vpack.c.bf16 %v598_v46, %v406_v45  ;;  %v1241_v7 = vrot.slane %v1227_v61, %v9427_v25  ;;  %v1261_v46 = vcombine.high %v269_v38, %v269_v38  ;;  %v612_v61 = vld [vmem:[%s9399_s27 + $0xa38] sm:$0x3] }
 0x13b   : > { %8793 = vmatpush1.bf16.xpose.msra.mxu1 %v8792_v8  ;;  %5569 = vmatprep.mubr.f32.mxu0 %v1191_v9 }
 0x13c   : > { %8795 = vmatprep.subr.bf16.mxu0 %v8794_v10  ;;  %v1791_v19 = vpop.f32.mrb[0].mxu0  ;;  %5639 = vmatprep.mubr.f32.mxu1 %v1192_v11  ;;  %v412_v11 = vld [vmem:[%s9399_s27 + $0x3f8] sm:$0xff] }
 0x13d   : > { %v1861_v20 = vpop.f32.mrb[0].mxu1  ;;  %8799 = vmatprep.subr.bf16.mxu1 %v8798_v12  ;;  %v1793_v26 = vpop.f32.mrb[1].mxu0  ;;  %v604_v12 = vld [vmem:[%s9399_s27 + $0x9f8] sm:$0x3] }
 0x13e   : > { %v1862_v24 = vadd.f32 %v1861_v20, %v1791_v19  ;;  %v1863_v27 = vpop.f32.mrb[1].mxu1  ;;  %v1243_v19 = vcombine.high %v1241_v7, %v1241_v7  ;;  %v8822_v20 = vpack.c.bf16 %v604_v12, %v412_v11  ;;  %v603_v26 = vld [vmem:[%s9399_s27 + $0x9f0] sm:$0x3]  ;;  %v1285_v11 = vrot.slane %v270_v62, %v9427_v25 }
 0x13f   : > { %v1251_v27 = vrot.slane %v268_v13, %v9427_v25 }
 0x141   : > { %5570 = vmatmul.mubr.f32.vlgmr.msra.gmra.mrb[54].mxu0 %v1183_v0  ;;  %v407_v0 = vld [vmem:[%s9399_s27 + $0x3d0] sm:$0xff] }
 0x142   : > { %5640 = vmatmul.mubr.f32.vlgmr.msra.gmra.mrb[54].mxu1 %v1190_v3  ;;  %8797 = vmatpush1.bf16.xpose.msra.mxu0 %v8796_v31  ;;  %v8816_v15 = vpack.c.bf16 %v599_v1, %v407_v0  ;;  %v606_v31 = vld [vmem:[%s9399_s27 + $0xa08] sm:$0x3] }
 0x143   : > { %8801 = vmatpush1.bf16.xpose.msra.mxu1 %v8800_v32  ;;  %5709 = vmatprep.mubr.f32.mxu0 %v1208_v33  ;;  %v1258_v32 = vrot.slane %v1244_v21, %v9427_v25  ;;  %v616_v21 = vld [vmem:[%s9399_s27 + $0xa58] sm:$0x3] }
 0x144   : > { %8803 = vmatprep.subr.bf16.mxu0 %v8802_v34  ;;  %v1931_v43 = vpop.f32.mrb[2].mxu0  ;;  %5779 = vmatprep.mubr.f32.mxu1 %v1209_v35 }
 0x145   : > { %v2001_v44 = vpop.f32.mrb[2].mxu1  ;;  %8807 = vmatprep.subr.bf16.mxu1 %v8806_v36  ;;  %v1932_v48 = vadd.f32 %v1931_v43, %v1862_v24  ;;  %v1933_v49 = vpop.f32.mrb[3].mxu0  ;;  %v411_v24 = vld [vmem:[%s9399_s27 + $0x3f0] sm:$0xff]  ;;  %v416_v36 = vld [vmem:[%s9399_s27 + $0x418] sm:$0xff]  ;;  %v8826_v43 = vpack.c.bf16 %v606_v31, %v414_v30 }
 0x146   : > { %v2003_v50 = vpop.f32.mrb[3].mxu1  ;;  %v8824_v40 = vpack.c.bf16 %v603_v26, %v411_v24  ;;  %v8830_v45 = vpack.c.bf16 %v608_v37, %v416_v36  ;;  %v415_v49 = vld [vmem:[%s9399_s27 + $0x410] sm:$0xff] }
 0x147   : > { %v2002_v56 = vadd.f32 %v2001_v44, %v1932_v48  ;;  %v1260_v44 = vcombine.high %v1258_v32, %v1258_v32  ;;  %v605_v48 = vld [vmem:[%s9399_s27 + $0xa00] sm:$0x3]  ;;  %v607_v50 = vld [vmem:[%s9399_s27 + $0xa10] sm:$0x3] }
 0x148   : > { %v8832_v0 = vpack.c.bf16 %v607_v50, %v415_v49 }
 0x149   : > { %5710 = vmatmul.mubr.f32.vlgmr.msra.gmra.mrb[56].mxu0 %v1200_v18  ;;  %v8818_v18 = vpack.c.bf16 %v602_v6, %v410_v5  ;;  %v1278_v6 = vcombine.high %v270_v62, %v270_v62 }
 0x14a   : > { %5780 = vmatmul.mubr.f32.vlgmr.msra.gmra.mrb[56].mxu1 %v1207_v23  ;;  %8805 = vmatpush1.bf16.xpose.msra.mxu0 %v8804_v54  ;;  %v601_v23 = vld [vmem:[%s9399_s27 + $0x9e0] sm:$0x3]  ;;  %v418_v54 = vld [vmem:[%s9399_s27 + $0x428] sm:$0xff] }
 0x14b   : > { %8809 = vmatpush1.bf16.xpose.msra.mxu1 %v8808_v55  ;;  %5849 = vmatprep.mubr.f32.mxu0 %v1225_v57  ;;  %v8820_v39 = vpack.c.bf16 %v601_v23, %v409_v22  ;;  %v610_v55 = vld [vmem:[%s9399_s27 + $0xa28] sm:$0x3]  ;;  %v271_v22 = vld [vmem:[%s9393_s6 + $0x110] sm:$0xff] }
 0x14c   : > { %8811 = vmatprep.subr.bf16.mxu0 %v8810_v58  ;;  %v2071_v3 = vpop.f32.mrb[4].mxu0  ;;  %5919 = vmatprep.mubr.f32.mxu1 %v1226_v59  ;;  %v1295_v31 = vcombine.high %v271_v22, %v271_v22  ;;  %v1302_v36 = vrot.slane %v271_v22, %v9427_v25 }
 0x14d   : > { %v2141_v4 = vpop.f32.mrb[4].mxu1  ;;  %8815 = vmatprep.subr.bf16.mxu1 %v8814_v60  ;;  %v2072_v8 = vadd.f32 %v2071_v3, %v2002_v56  ;;  %v2073_v9 = vpop.f32.mrb[5].mxu0  ;;  %v1275_v56 = vrot.slane %v1261_v46, %v9427_v25  ;;  %v420_v60 = vld [vmem:[%s9399_s27 + $0x438] sm:$0xff]  ;;  %v8834_v3 = vpack.c.bf16 %v610_v55, %v418_v54 }
 0x14e   : > { %v2143_v10 = vpop.f32.mrb[5].mxu1  ;;  %v8838_v5 = vpack.c.bf16 %v612_v61, %v420_v60  ;;  %v419_v9 = vld [vmem:[%s9399_s27 + $0x430] sm:$0xff]  ;;  %v620_v46 = vld [vmem:[%s9399_s27 + $0xa78] sm:$0x3] }
 0x14f   : > { %v2142_v16 = vadd.f32 %v2141_v4, %v2072_v8  ;;  %v1277_v4 = vcombine.high %v1275_v56, %v1275_v56  ;;  %v609_v8 = vld [vmem:[%s9399_s27 + $0xa20] sm:$0x3]  ;;  %v611_v10 = vld [vmem:[%s9399_s27 + $0xa30] sm:$0x3] }
 0x150   : > { %v8840_v24 = vpack.c.bf16 %v611_v10, %v419_v9 }
 0x151   : > { %5850 = vmatmul.mubr.f32.vlgmr.msra.gmra.mrb[58].mxu0 %v1217_v42  ;;  %v1259_v42 = vcombine.high %v1251_v27, %v1251_v27 }
 0x152   : > { %5920 = vmatmul.mubr.f32.vlgmr.msra.gmra.mrb[58].mxu1 %v1224_v47  ;;  %8813 = vmatpush1.bf16.xpose.msra.mxu0 %v8812_v14  ;;  %v413_v47 = vld [vmem:[%s9399_s27 + $0x400] sm:$0xff]  ;;  %v422_v14 = vld [vmem:[%s9399_s27 + $0x448] sm:$0xff] }
 0x153   : > { %8817 = vmatpush1.bf16.xpose.msra.mxu1 %v8816_v15  ;;  %5989 = vmatprep.mubr.f32.mxu0 %v1242_v17  ;;  %v8828_v63 = vpack.c.bf16 %v605_v48, %v413_v47  ;;  %v614_v15 = vld [vmem:[%s9399_s27 + $0xa48] sm:$0x3]  ;;  %v272_v47 = vld [vmem:[%s9393_s6 + $0x118] sm:$0xff] }
 0x154   : > { %8819 = vmatprep.subr.bf16.mxu0 %v8818_v18  ;;  %v2211_v28 = vpop.f32.mrb[6].mxu0  ;;  %6059 = vmatprep.mubr.f32.mxu1 %v1243_v19  ;;  %v1312_v55 = vcombine.high %v272_v47, %v272_v47  ;;  %v1319_v60 = vrot.slane %v272_v47, %v9427_v25 }
 0x155   : > { %v2281_v29 = vpop.f32.mrb[6].mxu1  ;;  %8823 = vmatprep.subr.bf16.mxu1 %v8822_v20  ;;  %v2212_v33 = vadd.f32 %v2211_v28, %v2142_v16  ;;  %v2213_v34 = vpop.f32.mrb[7].mxu0  ;;  %v1292_v16 = vrot.slane %v1278_v6, %v9427_v25  ;;  %v424_v20 = vld [vmem:[%s9399_s27 + $0x458] sm:$0xff]  ;;  %v8842_v28 = vpack.c.bf16 %v614_v15, %v422_v14 }
 0x156   : > { %v2283_v35 = vpop.f32.mrb[7].mxu1  ;;  %v8846_v30 = vpack.c.bf16 %v616_v21, %v424_v20  ;;  %v423_v34 = vld [vmem:[%s9399_s27 + $0x450] sm:$0xff]  ;;  %v624_v6 = vld [vmem:[%s9399_s27 + $0xa98] sm:$0x3] }
 0x157   : > { %v2282_v41 = vadd.f32 %v2281_v29, %v2212_v33  ;;  %v1294_v29 = vcombine.high %v1292_v16, %v1292_v16  ;;  %v613_v33 = vld [vmem:[%s9399_s27 + $0xa40] sm:$0x3]  ;;  %v615_v35 = vld [vmem:[%s9399_s27 + $0xa50] sm:$0x3] }
 0x158   : > { %v8848_v49 = vpack.c.bf16 %v615_v35, %v423_v34 }
 0x159   : > { %5990 = vmatmul.mubr.f32.vlgmr.msra.gmra.mrb[60].mxu0 %v1234_v2  ;;  %v1276_v2 = vcombine.high %v1268_v51, %v1268_v51 }
 0x15a   : > { %6060 = vmatmul.mubr.f32.vlgmr.msra.gmra.mrb[60].mxu1 %v1241_v7  ;;  %8821 = vmatpush1.bf16.xpose.msra.mxu0 %v8820_v39  ;;  %v417_v7 = vld [vmem:[%s9399_s27 + $0x420] sm:$0xff]  ;;  %v426_v39 = vld [vmem:[%s9399_s27 + $0x468] sm:$0xff] }
 0x15b   : > { %8825 = vmatpush1.bf16.xpose.msra.mxu1 %v8824_v40  ;;  %6129 = vmatprep.mubr.f32.mxu0 %v1259_v42  ;;  %v8836_v23 = vpack.c.bf16 %v609_v8, %v417_v7  ;;  %v618_v40 = vld [vmem:[%s9399_s27 + $0xa68] sm:$0x3]  ;;  %v273_v7 = vld [vmem:[%s9393_s6 + $0x120] sm:$0xff] }
 0x15c   : > { %8827 = vmatprep.subr.bf16.mxu0 %v8826_v43  ;;  %v2351_v52 = vpop.f32.mrb[8].mxu0  ;;  %6199 = vmatprep.mubr.f32.mxu1 %v1260_v44  ;;  %v1329_v15 = vcombine.high %v273_v7, %v273_v7  ;;  %v1336_v20 = vrot.slane %v273_v7, %v9427_v25 }
 0x15d   : > { %v2421_v53 = vpop.f32.mrb[8].mxu1  ;;  %8831 = vmatprep.subr.bf16.mxu1 %v8830_v45  ;;  %v2352_v57 = vadd.f32 %v2351_v52, %v2282_v41  ;;  %v2353_v58 = vpop.f32.mrb[9].mxu0  ;;  %v1309_v41 = vrot.slane %v1295_v31, %v9427_v25  ;;  %v428_v45 = vld [vmem:[%s9399_s27 + $0x478] sm:$0xff]  ;;  %v8850_v52 = vpack.c.bf16 %v618_v40, %v426_v39 }
 0x15e   : > { %v2423_v59 = vpop.f32.mrb[9].mxu1  ;;  %v8854_v54 = vpack.c.bf16 %v620_v46, %v428_v45  ;;  %v427_v58 = vld [vmem:[%s9399_s27 + $0x470] sm:$0xff]  ;;  %v628_v31 = vld [vmem:[%s9399_s27 + $0xab8] sm:$0x3] }
 0x15f   : > { %v2422_v1 = vadd.f32 %v2421_v53, %v2352_v57  ;;  %v1311_v53 = vcombine.high %v1309_v41, %v1309_v41  ;;  %v617_v57 = vld [vmem:[%s9399_s27 + $0xa60] sm:$0x3]  ;;  %v619_v59 = vld [vmem:[%s9399_s27 + $0xa70] sm:$0x3] }
 0x160   : > { %v8856_v9 = vpack.c.bf16 %v619_v59, %v427_v58 }
 0x161   : > { %6130 = vmatmul.mubr.f32.vlgmr.msra.gmra.mrb[62].mxu0 %v1251_v27  ;;  %v1293_v27 = vcombine.high %v1285_v11, %v1285_v11 }
 0x162   : > { %6200 = vmatmul.mubr.f32.vlgmr.msra.gmra.mrb[62].mxu1 %v1258_v32  ;;  %8829 = vmatpush1.bf16.xpose.msra.mxu0 %v8828_v63  ;;  %v421_v32 = vld [vmem:[%s9399_s27 + $0x440] sm:$0xff]  ;;  %v430_v63 = vld [vmem:[%s9399_s27 + $0x488] sm:$0xff] }
 0x163   : > { %8833 = vmatpush1.bf16.xpose.msra.mxu1 %v8832_v0  ;;  %6269 = vmatprep.mubr.f32.mxu0 %v1276_v2  ;;  %v8844_v48 = vpack.c.bf16 %v613_v33, %v421_v32  ;;  %v622_v0 = vld [vmem:[%s9399_s27 + $0xa88] sm:$0x3] }
 0x164   : > { %8835 = vmatprep.subr.bf16.mxu0 %v8834_v3  ;;  %v2491_v12 = vpop.f32.mrb[10].mxu0  ;;  %6339 = vmatprep.mubr.f32.mxu1 %v1277_v4  ;;  %v274_v32 = vld [vmem:[%s9393_s6 + $0x128] sm:$0xff] }
 0x165   : > { %v2561_v13 = vpop.f32.mrb[10].mxu1  ;;  %8839 = vmatprep.subr.bf16.mxu1 %v8838_v5  ;;  %v2492_v17 = vadd.f32 %v2491_v12, %v2422_v1  ;;  %v2493_v18 = vpop.f32.mrb[11].mxu0  ;;  %v1326_v1 = vrot.slane %v1312_v55, %v9427_v25  ;;  %v432_v5 = vld [vmem:[%s9399_s27 + $0x498] sm:$0xff]  ;;  %v8858_v12 = vpack.c.bf16 %v622_v0, %v430_v63  ;;  %v1346_v40 = vcombine.high %v274_v32, %v274_v32 }
 0x166   : > { %v2563_v19 = vpop.f32.mrb[11].mxu1  ;;  %v8862_v14 = vpack.c.bf16 %v624_v6, %v432_v5  ;;  %v431_v18 = vld [vmem:[%s9399_s27 + $0x490] sm:$0xff]  ;;  %v1353_v45 = vrot.slane %v274_v32, %v9427_v25  ;;  %v632_v55 = vld [vmem:[%s9399_s27 + $0xad8] sm:$0x3] }
 0x167   : > { %v2562_v26 = vadd.f32 %v2561_v13, %v2492_v17  ;;  %v1328_v13 = vcombine.high %v1326_v1, %v1326_v1  ;;  %v621_v17 = vld [vmem:[%s9399_s27 + $0xa80] sm:$0x3]  ;;  %v623_v19 = vld [vmem:[%s9399_s27 + $0xa90] sm:$0x3] }
 0x168   : > { %v8864_v34 = vpack.c.bf16 %v623_v19, %v431_v18 }
 0x169   : > { %6270 = vmatmul.mubr.f32.vlgmr.msra.gmra.mrb[64].mxu0 %v1268_v51  ;;  %v1310_v51 = vcombine.high %v1302_v36, %v1302_v36 }
 0x16a   : > { %6340 = vmatmul.mubr.f32.vlgmr.msra.gmra.mrb[64].mxu1 %v1275_v56  ;;  %8837 = vmatpush1.bf16.xpose.msra.mxu0 %v8836_v23  ;;  %v425_v56 = vld [vmem:[%s9399_s27 + $0x460] sm:$0xff]  ;;  %v434_v23 = vld [vmem:[%s9399_s27 + $0x4a8] sm:$0xff] }
 0x16b   : > { %8841 = vmatpush1.bf16.xpose.msra.mxu1 %v8840_v24  ;;  %6409 = vmatprep.mubr.f32.mxu0 %v1293_v27  ;;  %v8852_v8 = vpack.c.bf16 %v617_v57, %v425_v56  ;;  %v626_v24 = vld [vmem:[%s9399_s27 + $0xaa8] sm:$0x3]  ;;  %v275_v56 = vld [vmem:[%s9393_s6 + $0x130] sm:$0xff] }
 0x16c   : > { %8843 = vmatprep.subr.bf16.mxu0 %v8842_v28  ;;  %v2631_v37 = vpop.f32.mrb[12].mxu0  ;;  %6479 = vmatprep.mubr.f32.mxu1 %v1294_v29  ;;  %v1363_v0 = vcombine.high %v275_v56, %v275_v56  ;;  %v1370_v5 = vrot.slane %v275_v56, %v9427_v25 }
 0x16d   : > { %v2701_v38 = vpop.f32.mrb[12].mxu1  ;;  %8847 = vmatprep.subr.bf16.mxu1 %v8846_v30  ;;  %v2632_v42 = vadd.f32 %v2631_v37, %v2562_v26  ;;  %v2633_v43 = vpop.f32.mrb[13].mxu0  ;;  %v1343_v26 = vrot.slane %v1329_v15, %v9427_v25  ;;  %v436_v30 = vld [vmem:[%s9399_s27 + $0x4b8] sm:$0xff]  ;;  %v8866_v37 = vpack.c.bf16 %v626_v24, %v434_v23 }
 0x16e   : > { %v2703_v44 = vpop.f32.mrb[13].mxu1  ;;  %v8870_v39 = vpack.c.bf16 %v628_v31, %v436_v30  ;;  %v435_v43 = vld [vmem:[%s9399_s27 + $0x4b0] sm:$0xff]  ;;  %v636_v15 = vld [vmem:[%s9399_s27 + $0xaf8] sm:$0x3] }
 0x16f   : > { %v2702_v50 = vadd.f32 %v2701_v38, %v2632_v42  ;;  %v1345_v38 = vcombine.high %v1343_v26, %v1343_v26  ;;  %v625_v42 = vld [vmem:[%s9399_s27 + $0xaa0] sm:$0x3]  ;;  %v627_v44 = vld [vmem:[%s9399_s27 + $0xab0] sm:$0x3] }
 0x170   : > { %v8872_v58 = vpack.c.bf16 %v627_v44, %v435_v43 }
 0x171   : > { %6410 = vmatmul.mubr.f32.vlgmr.msra.gmra.mrb[66].mxu0 %v1285_v11  ;;  %v1327_v11 = vcombine.high %v1319_v60, %v1319_v60 }
 0x172   : > { %6480 = vmatmul.mubr.f32.vlgmr.msra.gmra.mrb[66].mxu1 %v1292_v16  ;;  %8845 = vmatpush1.bf16.xpose.msra.mxu0 %v8844_v48  ;;  %v429_v16 = vld [vmem:[%s9399_s27 + $0x480] sm:$0xff]  ;;  %v438_v48 = vld [vmem:[%s9399_s27 + $0x4c8] sm:$0xff] }
 0x173   : > { %8849 = vmatpush1.bf16.xpose.msra.mxu1 %v8848_v49  ;;  %6549 = vmatprep.mubr.f32.mxu0 %v1310_v51  ;;  %v8860_v33 = vpack.c.bf16 %v621_v17, %v429_v16  ;;  %v630_v49 = vld [vmem:[%s9399_s27 + $0xac8] sm:$0x3]  ;;  %v276_v16 = vld [vmem:[%s9393_s6 + $0x138] sm:$0xff] }
 0x174   : > { %8851 = vmatprep.subr.bf16.mxu0 %v8850_v52  ;;  %v2771_v61 = vpop.f32.mrb[14].mxu0  ;;  %6619 = vmatprep.mubr.f32.mxu1 %v1311_v53  ;;  %v1380_v24 = vcombine.high %v276_v16, %v276_v16  ;;  %v1387_v30 = vrot.slane %v276_v16, %v9427_v25 }
 0x175   : > { %v2841_v62 = vpop.f32.mrb[14].mxu1  ;;  %8855 = vmatprep.subr.bf16.mxu1 %v8854_v54  ;;  %v2772_v2 = vadd.f32 %v2771_v61, %v2702_v50  ;;  %v2773_v3 = vpop.f32.mrb[15].mxu0  ;;  %v1360_v50 = vrot.slane %v1346_v40, %v9427_v25  ;;  %v440_v54 = vld [vmem:[%s9399_s27 + $0x4d8] sm:$0xff]  ;;  %v8874_v61 = vpack.c.bf16 %v630_v49, %v438_v48 }
 0x176   : > { %v2843_v4 = vpop.f32.mrb[15].mxu1  ;;  %v8878_v63 = vpack.c.bf16 %v632_v55, %v440_v54  ;;  %v439_v3 = vld [vmem:[%s9399_s27 + $0x4d0] sm:$0xff]  ;;  %v640_v40 = vld [vmem:[%s9399_s27 + $0xb18] sm:$0x3] }
 0x177   : > { %v2842_v10 = vadd.f32 %v2841_v62, %v2772_v2  ;;  %v1362_v62 = vcombine.high %v1360_v50, %v1360_v50  ;;  %v629_v2 = vld [vmem:[%s9399_s27 + $0xac0] sm:$0x3]  ;;  %v631_v4 = vld [vmem:[%s9399_s27 + $0xad0] sm:$0x3] }
 0x178   : > { %v8880_v18 = vpack.c.bf16 %v631_v4, %v439_v3 }
 0x179   : > { %6550 = vmatmul.mubr.f32.vlgmr.msra.gmra.mrb[68].mxu0 %v1302_v36  ;;  %v1344_v36 = vcombine.high %v1336_v20, %v1336_v20 }
 0x17a   : > { %6620 = vmatmul.mubr.f32.vlgmr.msra.gmra.mrb[68].mxu1 %v1309_v41  ;;  %8853 = vmatpush1.bf16.xpose.msra.mxu0 %v8852_v8  ;;  %v433_v41 = vld [vmem:[%s9399_s27 + $0x4a0] sm:$0xff]  ;;  %v442_v8 = vld [vmem:[%s9399_s27 + $0x4e8] sm:$0xff] }
 0x17b   : > { %8857 = vmatpush1.bf16.xpose.msra.mxu1 %v8856_v9  ;;  %6689 = vmatprep.mubr.f32.mxu0 %v1327_v11  ;;  %v8868_v57 = vpack.c.bf16 %v625_v42, %v433_v41  ;;  %v634_v9 = vld [vmem:[%s9399_s27 + $0xae8] sm:$0x3]  ;;  %v277_v41 = vld [vmem:[%s9393_s6 + $0x140] sm:$0xff] }
 0x17c   : > { %8859 = vmatprep.subr.bf16.mxu0 %v8858_v12  ;;  %v2911_v21 = vpop.f32.mrb[16].mxu0  ;;  %6759 = vmatprep.mubr.f32.mxu1 %v1328_v13  ;;  %v1397_v49 = vcombine.high %v277_v41, %v277_v41  ;;  %v1404_v54 = vrot.slane %v277_v41, %v9427_v25 }
 0x17d   : > { %v2981_v22 = vpop.f32.mrb[16].mxu1  ;;  %8863 = vmatprep.subr.bf16.mxu1 %v8862_v14  ;;  %v2912_v27 = vadd.f32 %v2911_v21, %v2842_v10  ;;  %v2913_v28 = vpop.f32.mrb[17].mxu0  ;;  %v1377_v10 = vrot.slane %v1363_v0, %v9427_v25  ;;  %v444_v14 = vld [vmem:[%s9399_s27 + $0x4f8] sm:$0xff]  ;;  %v8882_v21 = vpack.c.bf16 %v634_v9, %v442_v8 }
 0x17e   : > { %v2983_v29 = vpop.f32.mrb[17].mxu1  ;;  %v8886_v23 = vpack.c.bf16 %v636_v15, %v444_v14  ;;  %v443_v28 = vld [vmem:[%s9399_s27 + $0x4f0] sm:$0xff]  ;;  %v644_v0 = vld [vmem:[%s9399_s27 + $0xb38] sm:$0x3] }
 0x17f   : > { %v2982_v35 = vadd.f32 %v2981_v22, %v2912_v27  ;;  %v1379_v22 = vcombine.high %v1377_v10, %v1377_v10  ;;  %v633_v27 = vld [vmem:[%s9399_s27 + $0xae0] sm:$0x3]  ;;  %v635_v29 = vld [vmem:[%s9399_s27 + $0xaf0] sm:$0x3] }
 0x180   : > { %v8888_v43 = vpack.c.bf16 %v635_v29, %v443_v28 }
 0x181   : > { %6690 = vmatmul.mubr.f32.vlgmr.msra.gmra.mrb[70].mxu0 %v1319_v60  ;;  %v1361_v60 = vcombine.high %v1353_v45, %v1353_v45 }
 0x182   : > { %6760 = vmatmul.mubr.f32.vlgmr.msra.gmra.mrb[70].mxu1 %v1326_v1  ;;  %8861 = vmatpush1.bf16.xpose.msra.mxu0 %v8860_v33  ;;  %v437_v1 = vld [vmem:[%s9399_s27 + $0x4c0] sm:$0xff]  ;;  %v446_v33 = vld [vmem:[%s9399_s27 + $0x508] sm:$0xff] }
 0x183   : > { %8865 = vmatpush1.bf16.xpose.msra.mxu1 %v8864_v34  ;;  %6829 = vmatprep.mubr.f32.mxu0 %v1344_v36  ;;  %v8876_v17 = vpack.c.bf16 %v629_v2, %v437_v1  ;;  %v638_v34 = vld [vmem:[%s9399_s27 + $0xb08] sm:$0x3] }
 0x184   : > { %8867 = vmatprep.subr.bf16.mxu0 %v8866_v37  ;;  %v3051_v46 = vpop.f32.mrb[18].mxu0  ;;  %6899 = vmatprep.mubr.f32.mxu1 %v1345_v38  ;;  %v278_v1 = vld [vmem:[%s9393_s6 + $0x148] sm:$0xff] }
 0x185   : > { %v3121_v47 = vpop.f32.mrb[18].mxu1  ;;  %8871 = vmatprep.subr.bf16.mxu1 %v8870_v39  ;;  %v3052_v51 = vadd.f32 %v3051_v46, %v2982_v35  ;;  %v3053_v52 = vpop.f32.mrb[19].mxu0  ;;  %v1394_v35 = vrot.slane %v1380_v24, %v9427_v25  ;;  %v448_v39 = vld [vmem:[%s9399_s27 + $0x518] sm:$0xff]  ;;  %v8890_v46 = vpack.c.bf16 %v638_v34, %v446_v33  ;;  %v1414_v9 = vcombine.high %v278_v1, %v278_v1 }
 0x186   : > { %v3123_v53 = vpop.f32.mrb[19].mxu1  ;;  %v8894_v48 = vpack.c.bf16 %v640_v40, %v448_v39  ;;  %v447_v52 = vld [vmem:[%s9399_s27 + $0x510] sm:$0xff]  ;;  %v1421_v14 = vrot.slane %v278_v1, %v9427_v25  ;;  %v648_v24 = vld [vmem:[%s9399_s27 + $0xb58] sm:$0x3] }
 0x187   : > { %v3122_v59 = vadd.f32 %v3121_v47, %v3052_v51  ;;  %v1396_v47 = vcombine.high %v1394_v35, %v1394_v35  ;;  %v637_v51 = vld [vmem:[%s9399_s27 + $0xb00] sm:$0x3]  ;;  %v639_v53 = vld [vmem:[%s9399_s27 + $0xb10] sm:$0x3] }
 0x188   : > { %v8896_v3 = vpack.c.bf16 %v639_v53, %v447_v52 }
 0x189   : > { %6830 = vmatmul.mubr.f32.vlgmr.msra.gmra.mrb[72].mxu0 %v1336_v20  ;;  %v1378_v20 = vcombine.high %v1370_v5, %v1370_v5 }
 0x18a   : > { %6900 = vmatmul.mubr.f32.vlgmr.msra.gmra.mrb[72].mxu1 %v1343_v26  ;;  %8869 = vmatpush1.bf16.xpose.msra.mxu0 %v8868_v57  ;;  %v441_v26 = vld [vmem:[%s9399_s27 + $0x4e0] sm:$0xff]  ;;  %v450_v57 = vld [vmem:[%s9399_s27 + $0x528] sm:$0xff] }
 0x18b   : > { %8873 = vmatpush1.bf16.xpose.msra.mxu1 %v8872_v58  ;;  %6969 = vmatprep.mubr.f32.mxu0 %v1361_v60  ;;  %v8884_v42 = vpack.c.bf16 %v633_v27, %v441_v26  ;;  %v642_v58 = vld [vmem:[%s9399_s27 + $0xb28] sm:$0x3]  ;;  %v279_v26 = vld [vmem:[%s9393_s6 + $0x150] sm:$0xff] }
 0x18c   : > { %8875 = vmatprep.subr.bf16.mxu0 %v8874_v61  ;;  %v3191_v6 = vpop.f32.mrb[20].mxu0  ;;  %7039 = vmatprep.mubr.f32.mxu1 %v1362_v62  ;;  %v1431_v34 = vcombine.high %v279_v26, %v279_v26  ;;  %v1438_v39 = vrot.slane %v279_v26, %v9427_v25 }
 0x18d   : > { %v3261_v7 = vpop.f32.mrb[20].mxu1  ;;  %8879 = vmatprep.subr.bf16.mxu1 %v8878_v63  ;;  %v3192_v11 = vadd.f32 %v3191_v6, %v3122_v59  ;;  %v3193_v12 = vpop.f32.mrb[21].mxu0  ;;  %v1411_v59 = vrot.slane %v1397_v49, %v9427_v25  ;;  %v452_v63 = vld [vmem:[%s9399_s27 + $0x538] sm:$0xff]  ;;  %v8898_v6 = vpack.c.bf16 %v642_v58, %v450_v57 }
 0x18e   : > { %v3263_v13 = vpop.f32.mrb[21].mxu1  ;;  %v8902_v8 = vpack.c.bf16 %v644_v0, %v452_v63  ;;  %v451_v12 = vld [vmem:[%s9399_s27 + $0x530] sm:$0xff]  ;;  %v652_v49 = vld [vmem:[%s9399_s27 + $0xb78] sm:$0x3] }
 0x18f   : > { %v3262_v19 = vadd.f32 %v3261_v7, %v3192_v11  ;;  %v1413_v7 = vcombine.high %v1411_v59, %v1411_v59  ;;  %v641_v11 = vld [vmem:[%s9399_s27 + $0xb20] sm:$0x3]  ;;  %v643_v13 = vld [vmem:[%s9399_s27 + $0xb30] sm:$0x3] }
 0x190   : > { %v8904_v28 = vpack.c.bf16 %v643_v13, %v451_v12 }
 0x191   : > { %6970 = vmatmul.mubr.f32.vlgmr.msra.gmra.mrb[74].mxu0 %v1353_v45  ;;  %v1395_v45 = vcombine.high %v1387_v30, %v1387_v30 }
 0x192   : > { %7040 = vmatmul.mubr.f32.vlgmr.msra.gmra.mrb[74].mxu1 %v1360_v50  ;;  %8877 = vmatpush1.bf16.xpose.msra.mxu0 %v8876_v17  ;;  %v445_v50 = vld [vmem:[%s9399_s27 + $0x500] sm:$0xff]  ;;  %v454_v17 = vld [vmem:[%s9399_s27 + $0x548] sm:$0xff] }
 0x193   : > { %8881 = vmatpush1.bf16.xpose.msra.mxu1 %v8880_v18  ;;  %7109 = vmatprep.mubr.f32.mxu0 %v1378_v20  ;;  %v8892_v2 = vpack.c.bf16 %v637_v51, %v445_v50  ;;  %v646_v18 = vld [vmem:[%s9399_s27 + $0xb48] sm:$0x3]  ;;  %v280_v50 = vld [vmem:[%s9393_s6 + $0x158] sm:$0xff] }
 0x194   : > { %8883 = vmatprep.subr.bf16.mxu0 %v8882_v21  ;;  %v3331_v31 = vpop.f32.mrb[22].mxu0  ;;  %7179 = vmatprep.mubr.f32.mxu1 %v1379_v22  ;;  %v1448_v58 = vcombine.high %v280_v50, %v280_v50  ;;  %v1455_v63 = vrot.slane %v280_v50, %v9427_v25 }
 0x195   : > { %v3401_v32 = vpop.f32.mrb[22].mxu1  ;;  %8887 = vmatprep.subr.bf16.mxu1 %v8886_v23  ;;  %v3332_v36 = vadd.f32 %v3331_v31, %v3262_v19  ;;  %v3333_v37 = vpop.f32.mrb[23].mxu0  ;;  %v1428_v19 = vrot.slane %v1414_v9, %v9427_v25  ;;  %v456_v23 = vld [vmem:[%s9399_s27 + $0x558] sm:$0xff]  ;;  %v8906_v31 = vpack.c.bf16 %v646_v18, %v454_v17 }
 0x196   : > { %v3403_v38 = vpop.f32.mrb[23].mxu1  ;;  %v8910_v33 = vpack.c.bf16 %v648_v24, %v456_v23  ;;  %v455_v37 = vld [vmem:[%s9399_s27 + $0x550] sm:$0xff]  ;;  %v656_v9 = vld [vmem:[%s9399_s27 + $0xb98] sm:$0x3] }
 0x197   : > { %v3402_v44 = vadd.f32 %v3401_v32, %v3332_v36  ;;  %v1430_v32 = vcombine.high %v1428_v19, %v1428_v19  ;;  %v645_v36 = vld [vmem:[%s9399_s27 + $0xb40] sm:$0x3]  ;;  %v647_v38 = vld [vmem:[%s9399_s27 + $0xb50] sm:$0x3] }
 0x198   : > { %v8912_v52 = vpack.c.bf16 %v647_v38, %v455_v37 }
 0x199   : > { %7110 = vmatmul.mubr.f32.vlgmr.msra.gmra.mrb[76].mxu0 %v1370_v5  ;;  %v1412_v5 = vcombine.high %v1404_v54, %v1404_v54 }
 0x19a   : > { %7180 = vmatmul.mubr.f32.vlgmr.msra.gmra.mrb[76].mxu1 %v1377_v10  ;;  %8885 = vmatpush1.bf16.xpose.msra.mxu0 %v8884_v42  ;;  %v449_v10 = vld [vmem:[%s9399_s27 + $0x520] sm:$0xff]  ;;  %v458_v42 = vld [vmem:[%s9399_s27 + $0x568] sm:$0xff] }
 0x19b   : > { %8889 = vmatpush1.bf16.xpose.msra.mxu1 %v8888_v43  ;;  %7249 = vmatprep.mubr.f32.mxu0 %v1395_v45  ;;  %v8900_v27 = vpack.c.bf16 %v641_v11, %v449_v10  ;;  %v650_v43 = vld [vmem:[%s9399_s27 + $0xb68] sm:$0x3]  ;;  %v281_v10 = vld [vmem:[%s9393_s6 + $0x160] sm:$0xff] }
 0x19c   : > { %8891 = vmatprep.subr.bf16.mxu0 %v8890_v46  ;;  %v3471_v55 = vpop.f32.mrb[24].mxu0  ;;  %7319 = vmatprep.mubr.f32.mxu1 %v1396_v47  ;;  %v1465_v18 = vcombine.high %v281_v10, %v281_v10  ;;  %v1472_v23 = vrot.slane %v281_v10, %v9427_v25 }
 0x19d   : > { %v3541_v56 = vpop.f32.mrb[24].mxu1  ;;  %8895 = vmatprep.subr.bf16.mxu1 %v8894_v48  ;;  %v3472_v60 = vadd.f32 %v3471_v55, %v3402_v44  ;;  %v3473_v61 = vpop.f32.mrb[25].mxu0  ;;  %v1445_v44 = vrot.slane %v1431_v34, %v9427_v25  ;;  %v460_v48 = vld [vmem:[%s9399_s27 + $0x578] sm:$0xff]  ;;  %v8914_v55 = vpack.c.bf16 %v650_v43, %v458_v42 }
 0x19e   : > { %v3543_v62 = vpop.f32.mrb[25].mxu1  ;;  %v8918_v57 = vpack.c.bf16 %v652_v49, %v460_v48  ;;  %v459_v61 = vld [vmem:[%s9399_s27 + $0x570] sm:$0xff]  ;;  %v660_v34 = vld [vmem:[%s9399_s27 + $0xbb8] sm:$0x3] }
 0x19f   : > { %v3542_v4 = vadd.f32 %v3541_v56, %v3472_v60  ;;  %v1447_v56 = vcombine.high %v1445_v44, %v1445_v44  ;;  %v649_v60 = vld [vmem:[%s9399_s27 + $0xb60] sm:$0x3]  ;;  %v651_v62 = vld [vmem:[%s9399_s27 + $0xb70] sm:$0x3] }
 0x1a0   : > { %v8920_v12 = vpack.c.bf16 %v651_v62, %v459_v61 }
 0x1a1   : > { %7250 = vmatmul.mubr.f32.vlgmr.msra.gmra.mrb[78].mxu0 %v1387_v30  ;;  %v1429_v30 = vcombine.high %v1421_v14, %v1421_v14 }
 0x1a2   : > { %7320 = vmatmul.mubr.f32.vlgmr.msra.gmra.mrb[78].mxu1 %v1394_v35  ;;  %8893 = vmatpush1.bf16.xpose.msra.mxu0 %v8892_v2  ;;  %v453_v35 = vld [vmem:[%s9399_s27 + $0x540] sm:$0xff]  ;;  %v462_v2 = vld [vmem:[%s9399_s27 + $0x588] sm:$0xff] }
 0x1a3   : > { %8897 = vmatpush1.bf16.xpose.msra.mxu1 %v8896_v3  ;;  %7389 = vmatprep.mubr.f32.mxu0 %v1412_v5  ;;  %v8908_v51 = vpack.c.bf16 %v645_v36, %v453_v35  ;;  %v654_v3 = vld [vmem:[%s9399_s27 + $0xb88] sm:$0x3] }
 0x1a4   : > { %8899 = vmatprep.subr.bf16.mxu0 %v8898_v6  ;;  %v3611_v15 = vpop.f32.mrb[26].mxu0  ;;  %7459 = vmatprep.mubr.f32.mxu1 %v1413_v7  ;;  %v282_v35 = vld [vmem:[%s9393_s6 + $0x168] sm:$0xff] }
 0x1a5   : > { %v3681_v16 = vpop.f32.mrb[26].mxu1  ;;  %8903 = vmatprep.subr.bf16.mxu1 %v8902_v8  ;;  %v3612_v20 = vadd.f32 %v3611_v15, %v3542_v4  ;;  %v3613_v21 = vpop.f32.mrb[27].mxu0  ;;  %v1462_v4 = vrot.slane %v1448_v58, %v9427_v25  ;;  %v464_v8 = vld [vmem:[%s9399_s27 + $0x598] sm:$0xff]  ;;  %v8922_v15 = vpack.c.bf16 %v654_v3, %v462_v2  ;;  %v1482_v43 = vcombine.high %v282_v35, %v282_v35 }
 0x1a6   : > { %v3683_v22 = vpop.f32.mrb[27].mxu1  ;;  %v8926_v17 = vpack.c.bf16 %v656_v9, %v464_v8  ;;  %v463_v21 = vld [vmem:[%s9399_s27 + $0x590] sm:$0xff]  ;;  %v1489_v48 = vrot.slane %v282_v35, %v9427_v25  ;;  %v664_v58 = vld [vmem:[%s9399_s27 + $0xbd8] sm:$0x3] }
 0x1a7   : > { %v3682_v29 = vadd.f32 %v3681_v16, %v3612_v20  ;;  %v1464_v16 = vcombine.high %v1462_v4, %v1462_v4  ;;  %v653_v20 = vld [vmem:[%s9399_s27 + $0xb80] sm:$0x3]  ;;  %v655_v22 = vld [vmem:[%s9399_s27 + $0xb90] sm:$0x3] }
 0x1a8   : > { %v8928_v37 = vpack.c.bf16 %v655_v22, %v463_v21 }
 0x1a9   : > { %7390 = vmatmul.mubr.f32.vlgmr.msra.gmra.mrb[80].mxu0 %v1404_v54  ;;  %v1446_v54 = vcombine.high %v1438_v39, %v1438_v39 }
 0x1aa   : > { %7460 = vmatmul.mubr.f32.vlgmr.msra.gmra.mrb[80].mxu1 %v1411_v59  ;;  %8901 = vmatpush1.bf16.xpose.msra.mxu0 %v8900_v27  ;;  %v457_v59 = vld [vmem:[%s9399_s27 + $0x560] sm:$0xff]  ;;  %v466_v27 = vld [vmem:[%s9399_s27 + $0x5a8] sm:$0xff] }
 0x1ab   : > { %8905 = vmatpush1.bf16.xpose.msra.mxu1 %v8904_v28  ;;  %7529 = vmatprep.mubr.f32.mxu0 %v1429_v30  ;;  %v8916_v11 = vpack.c.bf16 %v649_v60, %v457_v59  ;;  %v658_v28 = vld [vmem:[%s9399_s27 + $0xba8] sm:$0x3]  ;;  %v283_v59 = vld [vmem:[%s9393_s6 + $0x170] sm:$0xff] }
 0x1ac   : > { %8907 = vmatprep.subr.bf16.mxu0 %v8906_v31  ;;  %v3751_v40 = vpop.f32.mrb[28].mxu0  ;;  %7599 = vmatprep.mubr.f32.mxu1 %v1430_v32  ;;  %v1499_v3 = vcombine.high %v283_v59, %v283_v59  ;;  %v1506_v8 = vrot.slane %v283_v59, %v9427_v25 }
 0x1ad   : > { %v3821_v41 = vpop.f32.mrb[28].mxu1  ;;  %8911 = vmatprep.subr.bf16.mxu1 %v8910_v33  ;;  %v3752_v45 = vadd.f32 %v3751_v40, %v3682_v29  ;;  %v3753_v46 = vpop.f32.mrb[29].mxu0  ;;  %v1479_v29 = vrot.slane %v1465_v18, %v9427_v25  ;;  %v468_v33 = vld [vmem:[%s9399_s27 + $0x5b8] sm:$0xff]  ;;  %v8930_v40 = vpack.c.bf16 %v658_v28, %v466_v27 }
 0x1ae   : > { %v3823_v47 = vpop.f32.mrb[29].mxu1  ;;  %v8934_v42 = vpack.c.bf16 %v660_v34, %v468_v33  ;;  %v467_v46 = vld [vmem:[%s9399_s27 + $0x5b0] sm:$0xff]  ;;  %v476_v18 = vld [vmem:[%s9399_s27 + $0x5f8] sm:$0xff] }
 0x1af   : > { %v3822_v53 = vadd.f32 %v3821_v41, %v3752_v45  ;;  %v1481_v41 = vcombine.high %v1479_v29, %v1479_v29  ;;  %v657_v45 = vld [vmem:[%s9399_s27 + $0xba0] sm:$0x3]  ;;  %v659_v47 = vld [vmem:[%s9399_s27 + $0xbb0] sm:$0x3] }
 0x1b0   : > { %v8936_v61 = vpack.c.bf16 %v659_v47, %v467_v46 }
 0x1b1   : > { %7530 = vmatmul.mubr.f32.vlgmr.msra.gmra.mrb[82].mxu0 %v1421_v14  ;;  %v1463_v14 = vcombine.high %v1455_v63, %v1455_v63 }
 0x1b2   : > { %7600 = vmatmul.mubr.f32.vlgmr.msra.gmra.mrb[82].mxu1 %v1428_v19  ;;  %8909 = vmatpush1.bf16.xpose.msra.mxu0 %v8908_v51  ;;  %v461_v19 = vld [vmem:[%s9399_s27 + $0x580] sm:$0xff]  ;;  %v470_v51 = vld [vmem:[%s9399_s27 + $0x5c8] sm:$0xff] }
 0x1b3   : > { %8913 = vmatpush1.bf16.xpose.msra.mxu1 %v8912_v52  ;;  %7669 = vmatprep.mubr.f32.mxu0 %v1446_v54  ;;  %v8924_v36 = vpack.c.bf16 %v653_v20, %v461_v19  ;;  %v662_v52 = vld [vmem:[%s9399_s27 + $0xbc8] sm:$0x3]  ;;  %v668_v19 = vld [vmem:[%s9399_s27 + $0xbf8] sm:$0x3] }
 0x1b4   : > { %8915 = vmatprep.subr.bf16.mxu0 %v8914_v55  ;;  %v3891_v0 = vpop.f32.mrb[30].mxu0  ;;  %7739 = vmatprep.mubr.f32.mxu1 %v1447_v56  ;;  %v8950_v28 = vpack.c.bf16 %v668_v19, %v476_v18 }
 0x1b5   : > { %v3961_v1 = vpop.f32.mrb[30].mxu1  ;;  %8919 = vmatprep.subr.bf16.mxu1 %v8918_v57  ;;  %v3892_v5 = vadd.f32 %v3891_v0, %v3822_v53  ;;  %v3893_v6 = vpop.f32.mrb[31].mxu0  ;;  %v1496_v53 = vrot.slane %v1482_v43, %v9427_v25  ;;  %v472_v57 = vld [vmem:[%s9399_s27 + $0x5d8] sm:$0xff]  ;;  %v8938_v0 = vpack.c.bf16 %v662_v52, %v470_v51 }
 0x1b6   : > { %v3963_v7 = vpop.f32.mrb[31].mxu1  ;;  %v8942_v2 = vpack.c.bf16 %v664_v58, %v472_v57  ;;  %v471_v6 = vld [vmem:[%s9399_s27 + $0x5d0] sm:$0xff] }
 0x1b7   : > { %v3962_v13 = vadd.f32 %v3961_v1, %v3892_v5  ;;  %v1498_v1 = vcombine.high %v1496_v53, %v1496_v53  ;;  %v661_v5 = vld [vmem:[%s9399_s27 + $0xbc0] sm:$0x3]  ;;  %v663_v7 = vld [vmem:[%s9399_s27 + $0xbd0] sm:$0x3] }
 0x1b8   : > { %v8944_v21 = vpack.c.bf16 %v663_v7, %v471_v6 }
 0x1b9   : > { %7670 = vmatmul.mubr.f32.vlgmr.msra.gmra.mrb[84].mxu0 %v1438_v39  ;;  %v1480_v39 = vcombine.high %v1472_v23, %v1472_v23 }
 0x1ba   : > { %7740 = vmatmul.mubr.f32.vlgmr.msra.gmra.mrb[84].mxu1 %v1445_v44  ;;  %8917 = vmatpush1.bf16.xpose.msra.mxu0 %v8916_v11  ;;  %v465_v44 = vld [vmem:[%s9399_s27 + $0x5a0] sm:$0xff]  ;;  %v474_v11 = vld [vmem:[%s9399_s27 + $0x5e8] sm:$0xff] }
 0x1bb   : > { %8921 = vmatpush1.bf16.xpose.msra.mxu1 %v8920_v12  ;;  %7809 = vmatprep.mubr.f32.mxu0 %v1463_v14  ;;  %v8932_v60 = vpack.c.bf16 %v657_v45, %v465_v44  ;;  %v666_v12 = vld [vmem:[%s9399_s27 + $0xbe8] sm:$0x3]  ;;  %v284_v14 = vld [vmem:[%s9393_s6 + $0x178] sm:$0xff] }
 0x1bc   : > { %8923 = vmatprep.subr.bf16.mxu0 %v8922_v15  ;;  %v4031_v24 = vpop.f32.mrb[32].mxu0  ;;  %7879 = vmatprep.mubr.f32.mxu1 %v1464_v16  ;;  %v1523_v33 = vrot.slane %v284_v14, %v9427_v25 }
 0x1bd   : > { %v4101_v26 = vpop.f32.mrb[32].mxu1  ;;  %8927 = vmatprep.subr.bf16.mxu1 %v8926_v17  ;;  %v4032_v30 = vadd.f32 %v4031_v24, %v3962_v13  ;;  %v4033_v31 = vpop.f32.mrb[33].mxu0  ;;  %v1513_v13 = vrot.slane %v1499_v3, %v9427_v25  ;;  %v8946_v24 = vpack.c.bf16 %v666_v12, %v474_v11 }
 0x1be   : > { %v4103_v32 = vpop.f32.mrb[33].mxu1  ;;  %v475_v31 = vld [vmem:[%s9399_s27 + $0x5f0] sm:$0xff]  ;;  %v1531_v43 = vcombine.high %v1523_v33, %v1523_v33 }
 0x1bf   : > { %v4102_v38 = vadd.f32 %v4101_v26, %v4032_v30  ;;  %v1516_v26 = vcombine.high %v284_v14, %v284_v14  ;;  %v1515_v27 = vcombine.high %v1513_v13, %v1513_v13  ;;  %v665_v30 = vld [vmem:[%s9399_s27 + $0xbe0] sm:$0x3]  ;;  %v667_v32 = vld [vmem:[%s9399_s27 + $0xbf0] sm:$0x3] }
 0x1c1   : > { %7810 = vmatmul.mubr.f32.vlgmr.msra.gmra.mrb[86].mxu0 %v1455_v63  ;;  %v1497_v63 = vcombine.high %v1489_v48, %v1489_v48  ;;  %v1530_v34 = vrot.slane %v1516_v26, %v9427_v25 }
 0x1c2   : > { %7880 = vmatmul.mubr.f32.vlgmr.msra.gmra.mrb[86].mxu1 %v1462_v4  ;;  %8925 = vmatpush1.bf16.xpose.msra.mxu0 %v8924_v36  ;;  %v469_v4 = vld [vmem:[%s9399_s27 + $0x5c0] sm:$0xff] }
 0x1c3   : > { %8929 = vmatpush1.bf16.xpose.msra.mxu1 %v8928_v37  ;;  %7949 = vmatprep.mubr.f32.mxu0 %v1480_v39  ;;  %v8940_v20 = vpack.c.bf16 %v661_v5, %v469_v4  ;;  %v1532_v44 = vcombine.high %v1530_v34, %v1530_v34 }
 0x1c4   : > { %8931 = vmatprep.subr.bf16.mxu0 %v8930_v40  ;;  %v4171_v49 = vpop.f32.mrb[34].mxu0  ;;  %8019 = vmatprep.mubr.f32.mxu1 %v1481_v41  ;;  %v8952_v41 = vpack.c.bf16 %v667_v32, %v475_v31 }
 0x1c5   : > { %v4241_v50 = vpop.f32.mrb[34].mxu1  ;;  %8935 = vmatprep.subr.bf16.mxu1 %v8934_v42  ;;  %v4172_v54 = vadd.f32 %v4171_v49, %v4102_v38  ;;  %v4173_v55 = vpop.f32.mrb[35].mxu0 }
 0x1c6   : > { %v4243_v56 = vpop.f32.mrb[35].mxu1 }
 0x1c7   : > { %v4242_v62 = vadd.f32 %v4241_v50, %v4172_v54 }
 0x1c9   : > { %7950 = vmatmul.mubr.f32.vlgmr.msra.gmra.mrb[88].mxu0 %v1472_v23  ;;  %v1514_v23 = vcombine.high %v1506_v8, %v1506_v8 }
 0x1ca   : > { %8020 = vmatmul.mubr.f32.vlgmr.msra.gmra.mrb[88].mxu1 %v1479_v29  ;;  %8933 = vmatpush1.bf16.xpose.msra.mxu0 %v8932_v60  ;;  %v473_v29 = vld [vmem:[%s9399_s27 + $0x5e0] sm:$0xff] }
 0x1cb   : > { %8937 = vmatpush1.bf16.xpose.msra.mxu1 %v8936_v61  ;;  %8089 = vmatprep.mubr.f32.mxu0 %v1497_v63  ;;  %v8948_v40 = vpack.c.bf16 %v665_v30, %v473_v29 }
 0x1cc   : > { %8939 = vmatprep.subr.bf16.mxu0 %v8938_v0  ;;  %v4311_v9 = vpop.f32.mrb[36].mxu0  ;;  %8159 = vmatprep.mubr.f32.mxu1 %v1498_v1 }
 0x1cd   : > { %v4381_v10 = vpop.f32.mrb[36].mxu1  ;;  %8943 = vmatprep.subr.bf16.mxu1 %v8942_v2  ;;  %v4312_v15 = vadd.f32 %v4311_v9, %v4242_v62  ;;  %v4313_v16 = vpop.f32.mrb[37].mxu0 }
 0x1ce   : > { %v4383_v17 = vpop.f32.mrb[37].mxu1 }
 0x1cf   : > { %v4382_v22 = vadd.f32 %v4381_v10, %v4312_v15 }
 0x1d1   : > { %8090 = vmatmul.mubr.f32.vlgmr.msra.gmra.mrb[90].mxu0 %v1489_v48 }
 0x1d2   : > { %8160 = vmatmul.mubr.f32.vlgmr.msra.gmra.mrb[90].mxu1 %v1496_v53  ;;  %8941 = vmatpush1.bf16.xpose.msra.mxu0 %v8940_v20 }
 0x1d3   : > { %8945 = vmatpush1.bf16.xpose.msra.mxu1 %v8944_v21  ;;  %8229 = vmatprep.mubr.f32.mxu0 %v1514_v23 }
 0x1d4   : > { %8947 = vmatprep.subr.bf16.mxu0 %v8946_v24  ;;  %v4451_v35 = vpop.f32.mrb[38].mxu0  ;;  %8299 = vmatprep.mubr.f32.mxu1 %v1515_v27 }
 0x1d5   : > { %v4521_v36 = vpop.f32.mrb[38].mxu1  ;;  %8951 = vmatprep.subr.bf16.mxu1 %v8950_v28  ;;  %v4452_v37 = vadd.f32 %v4451_v35, %v4382_v22  ;;  %v4453_v38 = vpop.f32.mrb[39].mxu0 }
 0x1d6   : > { %v4523_v39 = vpop.f32.mrb[39].mxu1 }
 0x1d7   : > { %v4522_v42 = vadd.f32 %v4521_v36, %v4452_v37 }
 0x1d9   : > { %8230 = vmatmul.mubr.f32.vlgmr.msra.gmra.mrb[92].mxu0 %v1506_v8 }
 0x1da   : > { %8300 = vmatmul.mubr.f32.vlgmr.msra.gmra.mrb[92].mxu1 %v1513_v13  ;;  %8949 = vmatpush1.bf16.xpose.msra.mxu0 %v8948_v40 }
 0x1db   : > { %8953 = vmatpush1.bf16.xpose.msra.mxu1 %v8952_v41  ;;  %8369 = vmatprep.mubr.f32.mxu0 %v1531_v43 }
 0x1dc   : > { %8439 = vmatprep.mubr.f32.mxu1 %v1532_v44  ;;  %v4591_v45 = vpop.f32.mrb[40].mxu0 }
 0x1dd   : > { %v4661_v25 = vpop.f32.mrb[40].mxu1  ;;  %v4592_v46 = vadd.f32 %v4591_v45, %v4522_v42  ;;  %v4593_v47 = vpop.f32.mrb[41].mxu0 }
 0x1de   : > { %v4663_v48 = vpop.f32.mrb[41].mxu1 }
 0x1df   : > { %v4662_v49 = vadd.f32 %v4661_v25, %v4592_v46 }
 0x1e1   : > { %8370 = vmatmul.mubr.f32.vlgmr.msra.gmra.mrb[94].mxu0 %v1523_v33 }
 0x1e2   : > { %8440 = vmatmul.mubr.f32.vlgmr.msra.gmra.mrb[94].mxu1 %v1530_v34 }
 0x1e4   : > { %v4731_v50 = vpop.f32.mrb[42].mxu0 }
 0x1e5   : > { %v4801_v51 = vpop.f32.mrb[42].mxu1  ;;  %v4732_v52 = vadd.f32 %v4731_v50, %v4662_v49  ;;  %v4733_v53 = vpop.f32.mrb[43].mxu0 }
 0x1e6   : > { %v4803_v54 = vpop.f32.mrb[43].mxu1 }
 0x1e7   : > { %v4802_v55 = vadd.f32 %v4801_v51, %v4732_v52 }
 0x1ec   : > { %v4871_v56 = vpop.f32.mrb[44].mxu0 }
 0x1ed   : > { %v4941_v57 = vpop.f32.mrb[44].mxu1  ;;  %v4872_v58 = vadd.f32 %v4871_v56, %v4802_v55  ;;  %v4873_v59 = vpop.f32.mrb[45].mxu0 }
 0x1ee   : > { %v4943_v60 = vpop.f32.mrb[45].mxu1 }
 0x1ef   : > { %v4942_v61 = vadd.f32 %v4941_v57, %v4872_v58 }
 0x1f4   : > { %v5011_v62 = vpop.f32.mrb[46].mxu0 }
 0x1f5   : > { %v5081_v63 = vpop.f32.mrb[46].mxu1  ;;  %v5012_v0 = vadd.f32 %v5011_v62, %v4942_v61  ;;  %v5013_v1 = vpop.f32.mrb[47].mxu0 }
 0x1f6   : > { %v5083_v2 = vpop.f32.mrb[47].mxu1 }
 0x1f7   : > { %v5082_v3 = vadd.f32 %v5081_v63, %v5012_v0 }
 0x1fc   : > { %v5151_v4 = vpop.f32.mrb[48].mxu0 }
 0x1fd   : > { %v5221_v5 = vpop.f32.mrb[48].mxu1  ;;  %v5152_v6 = vadd.f32 %v5151_v4, %v5082_v3  ;;  %v5153_v7 = vpop.f32.mrb[49].mxu0 }
 0x1fe   : > { %v5223_v8 = vpop.f32.mrb[49].mxu1 }
 0x1ff   : > { %v5222_v9 = vadd.f32 %v5221_v5, %v5152_v6 }
 0x204   : > { %v5291_v10 = vpop.f32.mrb[50].mxu0 }
 0x205   : > { %v5361_v11 = vpop.f32.mrb[50].mxu1  ;;  %v5292_v12 = vadd.f32 %v5291_v10, %v5222_v9  ;;  %v5293_v13 = vpop.f32.mrb[51].mxu0 }
 0x206   : > { %v5363_v14 = vpop.f32.mrb[51].mxu1 }
 0x207   : > { %v5362_v15 = vadd.f32 %v5361_v11, %v5292_v12 }
 0x20c   : > { %v5431_v16 = vpop.f32.mrb[52].mxu0 }
 0x20d   : > { %v5501_v17 = vpop.f32.mrb[52].mxu1  ;;  %v5432_v18 = vadd.f32 %v5431_v16, %v5362_v15  ;;  %v5433_v19 = vpop.f32.mrb[53].mxu0 }
 0x20e   : > { %v5503_v20 = vpop.f32.mrb[53].mxu1 }
 0x20f   : > { %v5502_v21 = vadd.f32 %v5501_v17, %v5432_v18 }
 0x214   : > { %v5571_v22 = vpop.f32.mrb[54].mxu0 }
 0x215   : > { %v5641_v23 = vpop.f32.mrb[54].mxu1  ;;  %v5572_v24 = vadd.f32 %v5571_v22, %v5502_v21  ;;  %v5573_v26 = vpop.f32.mrb[55].mxu0 }
 0x216   : > { %v5643_v27 = vpop.f32.mrb[55].mxu1 }
 0x217   : > { %v5642_v28 = vadd.f32 %v5641_v23, %v5572_v24 }
 0x21c   : > { %v5711_v29 = vpop.f32.mrb[56].mxu0 }
 0x21d   : > { %v5781_v30 = vpop.f32.mrb[56].mxu1  ;;  %v5712_v31 = vadd.f32 %v5711_v29, %v5642_v28  ;;  %v5713_v32 = vpop.f32.mrb[57].mxu0 }
 0x21e   : > { %v5783_v33 = vpop.f32.mrb[57].mxu1 }
 0x21f   : > { %v5782_v34 = vadd.f32 %v5781_v30, %v5712_v31 }
 0x224   : > { %v5851_v35 = vpop.f32.mrb[58].mxu0 }
 0x225   : > { %v5921_v36 = vpop.f32.mrb[58].mxu1  ;;  %v5852_v37 = vadd.f32 %v5851_v35, %v5782_v34  ;;  %v5853_v38 = vpop.f32.mrb[59].mxu0 }
 0x226   : > { %v5923_v39 = vpop.f32.mrb[59].mxu1 }
 0x227   : > { %v5922_v40 = vadd.f32 %v5921_v36, %v5852_v37 }
 0x22c   : > { %v5991_v41 = vpop.f32.mrb[60].mxu0 }
 0x22d   : > { %v6061_v42 = vpop.f32.mrb[60].mxu1  ;;  %v5992_v43 = vadd.f32 %v5991_v41, %v5922_v40  ;;  %v5993_v44 = vpop.f32.mrb[61].mxu0 }
 0x22e   : > { %v6063_v45 = vpop.f32.mrb[61].mxu1 }
 0x22f   : > { %v6062_v25 = vadd.f32 %v6061_v42, %v5992_v43 }
 0x234   : > { %v6131_v46 = vpop.f32.mrb[62].mxu0 }
 0x235   : > { %v6201_v47 = vpop.f32.mrb[62].mxu1  ;;  %v6132_v48 = vadd.f32 %v6131_v46, %v6062_v25  ;;  %v6133_v49 = vpop.f32.mrb[63].mxu0 }
 0x236   : > { %v6203_v50 = vpop.f32.mrb[63].mxu1 }
 0x237   : > { %v6202_v51 = vadd.f32 %v6201_v47, %v6132_v48 }
 0x23c   : > { %v6271_v52 = vpop.f32.mrb[64].mxu0 }
 0x23d   : > { %v6341_v53 = vpop.f32.mrb[64].mxu1  ;;  %v6272_v54 = vadd.f32 %v6271_v52, %v6202_v51  ;;  %v6273_v55 = vpop.f32.mrb[65].mxu0 }
 0x23e   : > { %v6343_v56 = vpop.f32.mrb[65].mxu1 }
 0x23f   : > { %v6342_v57 = vadd.f32 %v6341_v53, %v6272_v54 }
 0x244   : > { %v6411_v58 = vpop.f32.mrb[66].mxu0 }
 0x245   : > { %v6481_v59 = vpop.f32.mrb[66].mxu1  ;;  %v6412_v60 = vadd.f32 %v6411_v58, %v6342_v57  ;;  %v6413_v61 = vpop.f32.mrb[67].mxu0 }
 0x246   : > { %v6483_v62 = vpop.f32.mrb[67].mxu1 }
 0x247   : > { %v6482_v63 = vadd.f32 %v6481_v59, %v6412_v60 }
 0x24c   : > { %v6551_v0 = vpop.f32.mrb[68].mxu0 }
 0x24d   : > { %v6621_v1 = vpop.f32.mrb[68].mxu1  ;;  %v6552_v2 = vadd.f32 %v6551_v0, %v6482_v63  ;;  %v6553_v3 = vpop.f32.mrb[69].mxu0 }
 0x24e   : > { %v6623_v4 = vpop.f32.mrb[69].mxu1 }
 0x24f   : > { %v6622_v5 = vadd.f32 %v6621_v1, %v6552_v2 }
 0x254   : > { %v6691_v6 = vpop.f32.mrb[70].mxu0 }
 0x255   : > { %v6761_v7 = vpop.f32.mrb[70].mxu1  ;;  %v6692_v8 = vadd.f32 %v6691_v6, %v6622_v5  ;;  %v6693_v9 = vpop.f32.mrb[71].mxu0 }
 0x256   : > { %v6763_v10 = vpop.f32.mrb[71].mxu1 }
 0x257   : > { %v6762_v11 = vadd.f32 %v6761_v7, %v6692_v8 }
 0x25c   : > { %v6831_v12 = vpop.f32.mrb[72].mxu0 }
 0x25d   : > { %v6901_v13 = vpop.f32.mrb[72].mxu1  ;;  %v6832_v14 = vadd.f32 %v6831_v12, %v6762_v11  ;;  %v6833_v15 = vpop.f32.mrb[73].mxu0 }
 0x25e   : > { %v6903_v16 = vpop.f32.mrb[73].mxu1 }
 0x25f   : > { %v6902_v17 = vadd.f32 %v6901_v13, %v6832_v14 }
 0x264   : > { %v6971_v18 = vpop.f32.mrb[74].mxu0 }
 0x265   : > { %v7041_v19 = vpop.f32.mrb[74].mxu1  ;;  %v6972_v20 = vadd.f32 %v6971_v18, %v6902_v17  ;;  %v6973_v21 = vpop.f32.mrb[75].mxu0 }
 0x266   : > { %v7043_v22 = vpop.f32.mrb[75].mxu1 }
 0x267   : > { %v7042_v23 = vadd.f32 %v7041_v19, %v6972_v20  ;;  %v236_v19 = vld [vmem:[%s9410_s22] sm:$0x3] }
 0x26c   : > { %v7111_v24 = vpop.f32.mrb[76].mxu0 }
 0x26d   : > { %v7181_v26 = vpop.f32.mrb[76].mxu1  ;;  %v7112_v27 = vadd.f32 %v7111_v24, %v7042_v23  ;;  %v7113_v28 = vpop.f32.mrb[77].mxu0 }
 0x26e   : > { %v7183_v29 = vpop.f32.mrb[77].mxu1 }
 0x26f   : > { %v7182_v30 = vadd.f32 %v7181_v26, %v7112_v27 }
 0x274   : > { %v7251_v31 = vpop.f32.mrb[78].mxu0 }
 0x275   : > { %v7321_v32 = vpop.f32.mrb[78].mxu1  ;;  %v7252_v33 = vadd.f32 %v7251_v31, %v7182_v30  ;;  %v7253_v34 = vpop.f32.mrb[79].mxu0 }
 0x276   : > { %v7323_v35 = vpop.f32.mrb[79].mxu1 }
 0x277   : > { %v7322_v36 = vadd.f32 %v7321_v32, %v7252_v33 }
 0x27c   : > { %v7391_v37 = vpop.f32.mrb[80].mxu0 }
 0x27d   : > { %v7461_v38 = vpop.f32.mrb[80].mxu1  ;;  %v7392_v39 = vadd.f32 %v7391_v37, %v7322_v36  ;;  %v7393_v40 = vpop.f32.mrb[81].mxu0 }
 0x27e   : > { %v7463_v41 = vpop.f32.mrb[81].mxu1 }
 0x27f   : > { %v7462_v42 = vadd.f32 %v7461_v38, %v7392_v39 }
 0x284   : > { %v7531_v43 = vpop.f32.mrb[82].mxu0 }
 0x285   : > { %v7601_v44 = vpop.f32.mrb[82].mxu1  ;;  %v7532_v45 = vadd.f32 %v7531_v43, %v7462_v42  ;;  %v7533_v25 = vpop.f32.mrb[83].mxu0 }
 0x286   : > { %v7603_v46 = vpop.f32.mrb[83].mxu1 }
 0x287   : > { %v7602_v47 = vadd.f32 %v7601_v44, %v7532_v45 }
 0x28c   : > { %v7671_v48 = vpop.f32.mrb[84].mxu0 }
 0x28d   : > { %v7741_v49 = vpop.f32.mrb[84].mxu1  ;;  %v7672_v50 = vadd.f32 %v7671_v48, %v7602_v47  ;;  %v7673_v51 = vpop.f32.mrb[85].mxu0 }
 0x28e   : > { %v7743_v52 = vpop.f32.mrb[85].mxu1 }
 0x28f   : > { %v7742_v53 = vadd.f32 %v7741_v49, %v7672_v50 }
 0x294   : > { %v7811_v54 = vpop.f32.mrb[86].mxu0 }
 0x295   : > { %v7881_v55 = vpop.f32.mrb[86].mxu1  ;;  %v7812_v56 = vadd.f32 %v7811_v54, %v7742_v53  ;;  %v7813_v57 = vpop.f32.mrb[87].mxu0 }
 0x296   : > { %v7883_v58 = vpop.f32.mrb[87].mxu1 }
 0x297   : > { %v7882_v59 = vadd.f32 %v7881_v55, %v7812_v56 }
 0x29c   : > { %v7951_v60 = vpop.f32.mrb[88].mxu0 }
 0x29d   : > { %v8021_v61 = vpop.f32.mrb[88].mxu1  ;;  %v7952_v62 = vadd.f32 %v7951_v60, %v7882_v59  ;;  %v7953_v63 = vpop.f32.mrb[89].mxu0 }
 0x29e   : > { %v8023_v0 = vpop.f32.mrb[89].mxu1 }
 0x29f   : > { %v8022_v1 = vadd.f32 %v8021_v61, %v7952_v62 }
 0x2a4   : > { %v8091_v2 = vpop.f32.mrb[90].mxu0 }
 0x2a5   : > { %v8161_v3 = vpop.f32.mrb[90].mxu1  ;;  %v8092_v4 = vadd.f32 %v8091_v2, %v8022_v1  ;;  %v8093_v5 = vpop.f32.mrb[91].mxu0 }
 0x2a6   : > { %v8163_v6 = vpop.f32.mrb[91].mxu1 }
 0x2a7   : > { %v8162_v7 = vadd.f32 %v8161_v3, %v8092_v4 }
 0x2ac   : > { %v8231_v8 = vpop.f32.mrb[92].mxu0 }
 0x2ad   : > { %v8301_v9 = vpop.f32.mrb[92].mxu1  ;;  %v8232_v10 = vadd.f32 %v8231_v8, %v8162_v7  ;;  %v8233_v11 = vpop.f32.mrb[93].mxu0 }
 0x2ae   : > { %v8303_v12 = vpop.f32.mrb[93].mxu1 }
 0x2af   : > { %v8302_v13 = vadd.f32 %v8301_v9, %v8232_v10 }
 0x2b4   : > { %v8371_v14 = vpop.f32.mrb[94].mxu0 }
 0x2b5   : > { %v8441_v15 = vpop.f32.mrb[94].mxu1  ;;  %v8372_v16 = vadd.f32 %v8371_v14, %v8302_v13  ;;  %v8373_v17 = vpop.f32.mrb[95].mxu0 }
 0x2b6   : > { %v8443_v18 = vpop.f32.mrb[95].mxu1 }
 0x2b7   : > { %v8442_v20 = vadd.f32 %v8441_v15, %v8372_v16 }
 0x2b9   : > { %v8445_v21 = vadd.f32 %v8442_v20, %v236_v19 }
 0x2bb   : > { %8447 = vst.msk [vmem:[%s9410_s22] sm:$0x3] %vm8446_vm1, %v8445_v21 }
 0x2bc PF: > { %s18_s16 = sadd.s32 1, %s9217_s16   ;;  %s9978_s9 = smov %s9193_s10 }
 0x2bd   : > { %p15_p5 = scmp.ge.s32.totalorder %s18_s16, 10   ;;  %s9979_s10 = smov %s9197_s11 }
 0x2be   : > { %s9980_s11 = smov %s9313_s30  ;;  %s9981_s12 = smov %s9209_s14 }
 0x2bf   : > { %s9982_s13 = smov %s9213_s15  ;;  %s9983_s14 = smov %s9986_s18 }
 0x2c0   : > { %s9984_s15 = smov %s9990_s19  ;;  %17 = sbr.rel (!%p15_p5) target bundleno = 7 (0x7), region = 85 }
 0x2c7   :  { %8467 = vsyncpa [#allocation3], 1 }
 0x2c8   :  { %8469 = vsyncpa [#allocation3 + $0x1], 1 }
 0x2c9   :  { %8470 = vsyncpa [#allocation5], 1 }
 0x2ca   :  { %8472 = vsyncpa [#allocation5 + $0x1], 1 }

</bundles_post_ra>
